<compile_context>
chip_gen: v7x
topology: tpu7x:2x2x1
jax: 0.10.0
libtpu: 0.0.40
codegen_flags: <defaults>
</compile_context>

<pallas_src>
import functools

import jax
import jax.numpy as jnp
from jax.experimental import pallas as pl
from jax.experimental.pallas import tpu as pltpu

LANE = 128


# ----------------------------------------------------------------------------
# Fused forward kernel (single invocation, everything resident in VMEM).
# ----------------------------------------------------------------------------
def _cn_mlp_kernel(x_ref, wm_ref, cm_ref, wc_ref, bias_ref, sel_ref, out_ref,
                   *, num_tasks, hid, use_attn):
    # mlp_out = dropout(Linear(5000, H)(x)); dropout is eval-mode identity.
    # bf16 operands, f32 accumulation on the MXU.
    mlp_out = (jnp.dot(x_ref[...], wm_ref[...],
                       preferred_element_type=jnp.float32) + bias_ref[0:1, :])   # (B, H) f32

    if use_attn:
        # sel_ref is attn (H, T): softmax task attention.
        logits = jnp.dot(mlp_out, sel_ref[...],
                         preferred_element_type=jnp.float32)                      # (B, T)
        w = jax.nn.softmax(logits, axis=-1)
    else:
        # sel_ref is one_hot(task_ids) (B, T), precomputed in the wrapper.
        w = sel_ref[...]

    # bmm(mlp_out, consensus) with consensus = sum_t w[:, t] * CM[t], evaluated
    # as one matmul against cm_flat (H, T*H) followed by a weighted sum of the
    # static, 128-aligned lane slices.  No (B, H, H) intermediate.
    p_all = jnp.dot(mlp_out.astype(jnp.bfloat16), cm_ref[...],
                    preferred_element_type=jnp.float32)                           # (B, T*H)
    acc = jnp.zeros_like(mlp_out)
    for t in range(num_tasks):
        acc = acc + w[:, t:t + 1] * p_all[:, t * hid:(t + 1) * hid]

    # cla = sigmoid(Linear(H, 1)(mlp_out_1)); head zero-padded to 128 lanes so
    # the output store is lane-dense.  Lane 0 carries the real scalar.
    cla = jax.nn.sigmoid(jnp.dot(acc.astype(jnp.bfloat16), wc_ref[...],
                                 preferred_element_type=jnp.float32) + bias_ref[1:2, :])
    out_ref[...] = cla                                                            # (B, 128)


# ----------------------------------------------------------------------------
# One-time parameter preparation (padding / casting / CM flattening).
# ----------------------------------------------------------------------------
def prepare_params(params):
    K, H = params["w_mlp"].shape
    T = params["cm"].shape[0]
    assert H == LANE, "lane-dense layout assumes mlp_hid == 128"
    Kp = ((K + LANE - 1) // LANE) * LANE

    wm = jnp.pad(params["w_mlp"], ((0, Kp - K), (0, 0))).astype(jnp.bfloat16)     # (Kp, H)
    cm_flat = (jnp.transpose(params["cm"], (1, 0, 2))
               .reshape(H, T * H).astype(jnp.bfloat16))                           # (H, T*H)
    wc = jnp.pad(params["w_cla"],
                 ((0, 0), (0, LANE - params["w_cla"].shape[1]))).astype(jnp.bfloat16)  # (H, 128)
    bc = jnp.pad(params["b_cla"], ((0, 0), (0, LANE - params["b_cla"].shape[1])))
    bias = jnp.concatenate([params["b_mlp"], bc], axis=0).astype(jnp.float32)     # (2, 128)
    attn = params["attn"].astype(jnp.float32)                                     # (H, T)
    return {"wm": wm, "cm_flat": cm_flat, "wc": wc, "bias": bias, "attn": attn}


def cn_mlp_forward(prep, data_input, task_ids):
    """prep: prepare_params() output; data_input: (B, 5000) f32;
    task_ids: (B,) int32 or None.  Returns (B,) f32."""
    B, K = data_input.shape
    Kp, H = prep["wm"].shape
    T = prep["attn"].shape[1]

    # Cheap per-call work: cast + lane-align the activations only (~40 KiB).
    x = jnp.pad(data_input.astype(jnp.bfloat16), ((0, 0), (0, Kp - K)))

    use_attn = task_ids is None
    sel = prep["attn"] if use_attn else jax.nn.one_hot(task_ids, T, dtype=jnp.float32)

    kernel = functools.partial(_cn_mlp_kernel, num_tasks=T, hid=H, use_attn=use_attn)
    vmem = lambda: pl.BlockSpec(memory_space=pltpu.MemorySpace.VMEM)

    bytes_accessed = (x.size * 2 + prep["wm"].size * 2 + prep["cm_flat"].size * 2
                      + prep["wc"].size * 2 + prep["bias"].size * 4
                      + sel.size * 4 + B * LANE * 4)
    flops = 2 * B * Kp * H + 2 * B * H * (T * H) + 2 * B * H * LANE + 2 * B * H * T

    out = pl.pallas_call(
        kernel,
        out_shape=jax.ShapeDtypeStruct((B, LANE), jnp.float32),
        in_specs=[vmem() for _ in range(6)],
        out_specs=vmem(),
        cost_estimate=pl.CostEstimate(flops=flops,
                                      transcendentals=B * (T + 1),
                                      bytes_accessed=bytes_accessed),
    )(x, prep["wm"], prep["cm_flat"], prep["wc"], prep["bias"], sel)
    return out[:, 0]


# ----------------------------------------------------------------------------
# Pure-JAX reference mirroring the PyTorch op order (for validation).
# ----------------------------------------------------------------------------
def cn_mlp_reference(params, data_input, task_ids):
    mlp_out = data_input @ params["w_mlp"] + params["b_mlp"]
    if task_ids is None:
        w = jax.nn.softmax(mlp_out @ params["attn"], axis=1)
        consensus = jnp.einsum("bt,thk->bhk", w, params["cm"])
    else:
        consensus = params["cm"][task_ids]
    mlp_out_1 = jnp.einsum("bh,bhk->bk", mlp_out, consensus)
    return jax.nn.sigmoid(mlp_out_1 @ params["w_cla"] + params["b_cla"])[:, 0]


# ----------------------------------------------------------------------------
# Deterministic parameter init (shapes follow the PyTorch module; xavier-style).
# TODO(synk): extraction_phase/aggregation_phase only toggle requires_grad
# (training-time), so they have no forward-pass equivalent here.
# ----------------------------------------------------------------------------
def init_params(key, in_dim, mlp_hid, num_tasks):
    ks = jax.random.split(key, 4)

    def xavier(k, shape, fan_in, fan_out):
        std = (2.0 / (fan_in + fan_out)) ** 0.5
        return std * jax.random.normal(k, shape, jnp.float32)

    return {
        "w_mlp": xavier(ks[0], (in_dim, mlp_hid), in_dim, mlp_hid),      # Linear(5000, H)
        "b_mlp": jnp.zeros((1, mlp_hid), jnp.float32),
        "cm": xavier(ks[1], (num_tasks, mlp_hid, mlp_hid), mlp_hid, mlp_hid),
        "attn": xavier(ks[2], (mlp_hid, num_tasks), mlp_hid, num_tasks),
        "w_cla": xavier(ks[3], (mlp_hid, 1), mlp_hid, 1),                # Linear(H, 1)
        "b_cla": jnp.zeros((1, 1), jnp.float32),
    }


if __name__ == "__main__":
    IN_DIM, MLP_HID, NUM_TASKS, B = 5000, 128, 4, 8

    key = jax.random.PRNGKey(0)
    k_par, k_x, k_t = jax.random.split(key, 3)
    params = init_params(k_par, IN_DIM, MLP_HID, NUM_TASKS)
    prep = jax.tree_util.tree_map(jax.block_until_ready, prepare_params(params))
    data_input = jax.random.normal(k_x, (B, IN_DIM), jnp.float32)
    task_ids = jax.random.randint(k_t, (B,), 0, NUM_TASKS, dtype=jnp.int32)

    fwd_task = jax.jit(lambda p, x, t: cn_mlp_forward(p, x, t))
    fwd_attn = jax.jit(lambda p, x: cn_mlp_forward(p, x, None))

    out_task = jax.block_until_ready(fwd_task(prep, data_input, task_ids))
    out_attn = jax.block_until_ready(fwd_attn(prep, data_input))

    ref_task = cn_mlp_reference(params, data_input, task_ids)
    ref_attn = cn_mlp_reference(params, data_input, None)

    assert out_task.shape == (B,) and out_attn.shape == (B,)
    assert jnp.allclose(out_task, ref_task, atol=2e-2, rtol=2e-2)
    assert jnp.allclose(out_attn, ref_attn, atol=2e-2, rtol=2e-2)
    print("KERNEL_OK")
</pallas_src>

<mosaic_0001>
module attributes {stable_mosaic.version = 11 : i64} {
  func.func @_cn_mlp_kernel(%arg0: memref<8x5120xbf16, #tpu.memory_space<vmem>>, %arg1: memref<5120x128xbf16, #tpu.memory_space<vmem>>, %arg2: memref<128x512xbf16, #tpu.memory_space<vmem>>, %arg3: memref<128x128xbf16, #tpu.memory_space<vmem>>, %arg4: memref<2x128xf32, #tpu.memory_space<vmem>>, %arg5: memref<8x4xf32, #tpu.memory_space<vmem>>, %arg6: memref<8x128xf32, #tpu.memory_space<vmem>>) attributes {dimension_semantics = [], scalar_prefetch = 0 : i64, scratch_operands = 0 : i64, tpu.core_type = #tpu.core_type<tc>} {
    %c0 = arith.constant 0 : index
    %c0_0 = arith.constant 0 : index
    %0 = vector.load %arg0[%c0, %c0_0] : memref<8x5120xbf16, #tpu.memory_space<vmem>>, vector<8x5120xbf16>
    %c0_1 = arith.constant 0 : index
    %c0_2 = arith.constant 0 : index
    %1 = vector.load %arg1[%c0_1, %c0_2] : memref<5120x128xbf16, #tpu.memory_space<vmem>>, vector<5120x128xbf16>
    %cst = arith.constant dense<0.000000e+00> : vector<8x128xf32>
    %2 = tpu.matmul %0, %1, %cst {dimension_numbers = #tpu.dot_dimension_numbers<[1], [0], [0], [1], [0, 0, 1, 1], [], []>} : vector<8x5120xbf16>, vector<5120x128xbf16>, vector<8x128xf32> -> vector<8x128xf32>
    %c0_3 = arith.constant 0 : index
    %c0_4 = arith.constant 0 : index
    %3 = vector.load %arg4[%c0_3, %c0_4] : memref<2x128xf32, #tpu.memory_space<vmem>>, vector<1x128xf32>
    %4 = vector.broadcast %3 : vector<1x128xf32> to vector<8x128xf32>
    %5 = arith.addf %2, %4 : vector<8x128xf32>
    %c0_5 = arith.constant 0 : index
    %c0_6 = arith.constant 0 : index
    %6 = vector.load %arg5[%c0_5, %c0_6] : memref<8x4xf32, #tpu.memory_space<vmem>>, vector<8x4xf32>
    %7 = arith.truncf %5 : vector<8x128xf32> to vector<8x128xbf16>
    %c0_7 = arith.constant 0 : index
    %c0_8 = arith.constant 0 : index
    %8 = vector.load %arg2[%c0_7, %c0_8] : memref<128x512xbf16, #tpu.memory_space<vmem>>, vector<128x512xbf16>
    %cst_9 = arith.constant dense<0.000000e+00> : vector<8x512xf32>
    %9 = tpu.matmul %7, %8, %cst_9 {dimension_numbers = #tpu.dot_dimension_numbers<[1], [0], [0], [1], [0, 0, 1, 1], [], []>} : vector<8x128xbf16>, vector<128x512xbf16>, vector<8x512xf32> -> vector<8x512xf32>
    %cst_10 = arith.constant 0.000000e+00 : f32
    %10 = vector.broadcast %cst_10 : f32 to vector<8x128xf32>
    %11 = vector.extract_strided_slice %6 {offsets = [0, 0], sizes = [8, 1], strides = [1, 1]} : vector<8x4xf32> to vector<8x1xf32>
    %12 = vector.extract_strided_slice %9 {offsets = [0, 0], sizes = [8, 128], strides = [1, 1]} : vector<8x512xf32> to vector<8x128xf32>
    %13 = vector.broadcast %11 : vector<8x1xf32> to vector<8x128xf32>
    %14 = arith.mulf %13, %12 : vector<8x128xf32>
    %15 = arith.addf %10, %14 : vector<8x128xf32>
    %16 = vector.extract_strided_slice %6 {offsets = [0, 1], sizes = [8, 1], strides = [1, 1]} : vector<8x4xf32> to vector<8x1xf32>
    %17 = vector.extract_strided_slice %9 {offsets = [0, 128], sizes = [8, 128], strides = [1, 1]} : vector<8x512xf32> to vector<8x128xf32>
    %18 = vector.broadcast %16 : vector<8x1xf32> to vector<8x128xf32>
    %19 = arith.mulf %18, %17 : vector<8x128xf32>
    %20 = arith.addf %15, %19 : vector<8x128xf32>
    %21 = vector.extract_strided_slice %6 {offsets = [0, 2], sizes = [8, 1], strides = [1, 1]} : vector<8x4xf32> to vector<8x1xf32>
    %22 = vector.extract_strided_slice %9 {offsets = [0, 256], sizes = [8, 128], strides = [1, 1]} : vector<8x512xf32> to vector<8x128xf32>
    %23 = vector.broadcast %21 : vector<8x1xf32> to vector<8x128xf32>
    %24 = arith.mulf %23, %22 : vector<8x128xf32>
    %25 = arith.addf %20, %24 : vector<8x128xf32>
    %26 = vector.extract_strided_slice %6 {offsets = [0, 3], sizes = [8, 1], strides = [1, 1]} : vector<8x4xf32> to vector<8x1xf32>
    %27 = vector.extract_strided_slice %9 {offsets = [0, 384], sizes = [8, 128], strides = [1, 1]} : vector<8x512xf32> to vector<8x128xf32>
    %28 = vector.broadcast %26 : vector<8x1xf32> to vector<8x128xf32>
    %29 = arith.mulf %28, %27 : vector<8x128xf32>
    %30 = arith.addf %25, %29 : vector<8x128xf32>
    %31 = arith.truncf %30 : vector<8x128xf32> to vector<8x128xbf16>
    %c0_11 = arith.constant 0 : index
    %c0_12 = arith.constant 0 : index
    %32 = vector.load %arg3[%c0_11, %c0_12] : memref<128x128xbf16, #tpu.memory_space<vmem>>, vector<128x128xbf16>
    %cst_13 = arith.constant dense<0.000000e+00> : vector<8x128xf32>
    %33 = tpu.matmul %31, %32, %cst_13 {dimension_numbers = #tpu.dot_dimension_numbers<[1], [0], [0], [1], [0, 0, 1, 1], [], []>} : vector<8x128xbf16>, vector<128x128xbf16>, vector<8x128xf32> -> vector<8x128xf32>
    %c1 = arith.constant 1 : index
    %c0_14 = arith.constant 0 : index
    %34 = vector.load %arg4[%c1, %c0_14] : memref<2x128xf32, #tpu.memory_space<vmem>>, vector<1x128xf32>
    %35 = vector.broadcast %34 : vector<1x128xf32> to vector<8x128xf32>
    %36 = arith.addf %33, %35 : vector<8x128xf32>
    %37 = arith.negf %36 : vector<8x128xf32>
    %38 = math.exp %37 : vector<8x128xf32>
    %cst_15 = arith.constant 1.000000e+00 : f32
    %39 = vector.broadcast %cst_15 : f32 to vector<8x128xf32>
    %40 = arith.addf %39, %38 : vector<8x128xf32>
    %41 = arith.divf %39, %40 : vector<8x128xf32>
    %c0_16 = arith.constant 0 : index
    %c0_17 = arith.constant 0 : index
    %42 = vector.load %arg6[%c0_16, %c0_17] : memref<8x128xf32, #tpu.memory_space<vmem>>, vector<8x128xf32>
    tpu.vector_store %arg6[%c0_16, %c0_17], %41 {strides = array<i32>} : memref<8x128xf32, #tpu.memory_space<vmem>>, vector<8x128xf32>,
    return
  }
}

</mosaic_0001>

<bundles_post_ra>
// kernel: _lambda_.1
= control target key start
LH: loop header
LB: loop body
LE: loop exit
PB: predicated region body
PF: predicated region fallthrough
CT: control target
= control target key end

     0   :  { %11 = vsyncpa [#allocation3], 0  ;;  %s5610_s0 = inlined_call_operand.vmem [shape: bf16[8,5120], index: 0, kind: input, shape index: {}]   ;;  %s5611_s1 = inlined_call_operand.hbm [shape: bf16[5120,128], index: 1, kind: input, shape index: {}]   ;;  %s5612_s2 = inlined_call_operand.hbm [shape: bf16[128,512], index: 2, kind: input, shape index: {}]   ;;  %s5613_s3 = inlined_call_operand.hbm [shape: bf16[128,128], index: 3, kind: input, shape index: {}]   ;;  %s5614_s4 = inlined_call_operand.hbm [shape: f32[2,128], index: 4, kind: input, shape index: {}]   ;;  %s5615_s5 = inlined_call_operand.vmem [shape: f32[8,4], index: 5, kind: input, shape index: {}]   ;;  %s5616_s6 = inlined_call_operand.vmem [shape: f32[8,128], index: 6, kind: output, shape index: {}]  }
   0x1   :  { %12 = vsyncpa [#allocation5], 0 }
   0x2   :  { %13 = vsyncpa [#allocation8], 0  ;;  %s5432_s21 = smov [#allocation4]   ;;  %s5338_s25 = scalar_lea.hbm %s5612_s2, 4096 }
   0x3   :  { %s33_s22 = sshll.u32 %s5432_s21, 4  ;;  %p5339_p0 = scmp.ne.s32.totalorder %s5612_s2, %s5338_s25  ;;  %s34_s22 = int_to_ptr.vmem [resolvable:$true] %s33_s22 }
   0x4   :  { %p5342_p1 = scmp.lt.u32.totalorder %s5338_s25, %s5612_s2 }
   0x6   :  { %p5344_p2 = pnand %p5342_p1, %p5339_p0 }
   0x8   :  { %5347 = shalt.err (!%p5344_p2)
}
   0x9   :  { %s5348_s30 = scalar_lea.vmem %s34_s22, 4096  ;;  %p5353_p4 = scmp.lt.s32.totalorder %s34_s22, %s34_s22 }
   0xa   :  { %p5349_p3 = scmp.ne.s32.totalorder %s34_s22, %s5348_s30  ;;  %p5354_p5 = scmp.lt.s32.totalorder %s5348_s30, %s5348_s30 }
   0xc   :  { %p5355_p6 = por %p5354_p5, %p5353_p4 }
   0xe   :  { %p5356_p7 = pnand %p5355_p6, %p5349_p3 }
  0x10   :  { %5359 = shalt.err (!%p5356_p7)
}
  0x11   :  { %s5433_s7 = smov 256   ;;  %s5434_s8 = smov 16  }
  0x12   :  { %39 = dma.hbm_to_vmem [thread:$0]  %s5612_s2, 4096, %s34_s22, [#allocation5], %s5433_s7, %s5433_s7, %s5434_s8  }
  0x13   :  { %s5435_s11 = smov [#allocation2]   ;;  %s5360_s15 = scalar_lea.hbm %s5611_s1, 40960 }
  0x14   :  { %s21_s12 = sshll.u32 %s5435_s11, 4  ;;  %p5361_p8 = scmp.ne.s32.totalorder %s5611_s1, %s5360_s15  ;;  %s22_s12 = int_to_ptr.vmem [resolvable:$true] %s21_s12 }
  0x15   :  { %p5364_p9 = scmp.lt.u32.totalorder %s5360_s15, %s5611_s1 }
  0x17   :  { %p5366_p10 = pnand %p5364_p9, %p5361_p8 }
  0x19   :  { %5369 = shalt.err (!%p5366_p10)
}
  0x1a   :  { %s5370_s20 = scalar_lea.vmem %s22_s12, 40960  ;;  %p5375_p12 = scmp.lt.s32.totalorder %s22_s12, %s22_s12 }
  0x1b   :  { %p5371_p11 = scmp.ne.s32.totalorder %s22_s12, %s5370_s20  ;;  %p5376_p13 = scmp.lt.s32.totalorder %s5370_s20, %s5370_s20 }
  0x1d   :  { %p5377_p0 = por %p5376_p13, %p5375_p12 }
  0x1f   :  { %p5378_p1 = pnand %p5377_p0, %p5371_p11 }
  0x21   :  { %5381 = shalt.err (!%p5378_p1)
}
  0x22   :  { %s5436_s2 = smov 64   ;;  %s5437_s21 = smov 4  }
  0x23   :  { %27 = dma.hbm_to_vmem [thread:$0]  %s5611_s1, 40960, %s22_s12, [#allocation3], %s5436_s2, %s5436_s2, %s5437_s21  }
  0x24   :  { %s5438_s24 = smov [#allocation6]   ;;  %s5439_s26 = smov [#allocation7]  }
  0x25   :  { %s45_s25 = sshll.u32 %s5438_s24, 4  ;;  %s58_s27 = sshll.u32 %s5439_s26, 4  ;;  %s46_s25 = int_to_ptr.vmem [resolvable:$true] %s45_s25  ;;  %s59_s27 = int_to_ptr.vmem [resolvable:$true] %s58_s27 }
  0x26   :  { %s5382_s30 = scalar_lea.hbm %s5613_s3, 1024 }
  0x27   :  { %p5383_p2 = scmp.ne.s32.totalorder %s5613_s3, %s5382_s30  ;;  %p5386_p3 = scmp.lt.u32.totalorder %s5382_s30, %s5613_s3 }
  0x29   :  { %p5388_p4 = pnand %p5386_p3, %p5383_p2 }
  0x2b   :  { %5391 = shalt.err (!%p5388_p4)
}
  0x2c   :  { %s5392_s1 = scalar_lea.vmem %s46_s25, 1024  ;;  %p5397_p6 = scmp.lt.s32.totalorder %s46_s25, %s46_s25 }
  0x2d   :  { %p5393_p5 = scmp.ne.s32.totalorder %s46_s25, %s5392_s1  ;;  %p5398_p7 = scmp.lt.s32.totalorder %s5392_s1, %s5392_s1 }
  0x2f   :  { %p5399_p8 = por %p5398_p7, %p5397_p6 }
  0x31   :  { %p5400_p9 = pnand %p5399_p8, %p5393_p5 }
  0x33   :  { %5403 = shalt.err (!%p5400_p9)
}
  0x34   :  { %51 = dma.hbm_to_vmem [thread:$0]  %s5613_s3, 1024, %s46_s25, [#allocation5], %s5436_s2, %s5436_s2, %s5437_s21  }
  0x35   :  { %s5404_s15 = scalar_lea.hbm %s5614_s4, 32 }
  0x36   :  { %p5405_p10 = scmp.ne.s32.totalorder %s5614_s4, %s5404_s15  ;;  %p5408_p11 = scmp.lt.u32.totalorder %s5404_s15, %s5614_s4 }
  0x38   :  { %p5410_p12 = pnand %p5408_p11, %p5405_p10 }
  0x3a   :  { %5413 = shalt.err (!%p5410_p12)
}
  0x3b   :  { %s5414_s20 = scalar_lea.vmem %s59_s27, 32  ;;  %p5419_p0 = scmp.lt.s32.totalorder %s59_s27, %s59_s27 }
  0x3c   :  { %p5415_p13 = scmp.ne.s32.totalorder %s59_s27, %s5414_s20  ;;  %p5420_p1 = scmp.lt.s32.totalorder %s5414_s20, %s5414_s20 }
  0x3e   :  { %p5421_p2 = por %p5420_p1, %p5419_p0 }
  0x40   :  { %p5422_p3 = pnand %p5421_p2, %p5415_p13 }
  0x42   :  { %5425 = shalt.err (!%p5422_p3)
}
  0x43   :  { %61 = dma.hbm_to_vmem [thread:$0]  %s5614_s4, 32, %s59_s27, [#allocation8]  }
  0x44   :  { %5426 = dma.done.wait [#allocation3], 40960  }
  0x45   :  { %5427 = vsyncadd [#allocation3], 4294926336 }
  0x46   :  { %5428 = dma.done.wait [#allocation5], 5120  }
  0x47   :  { %5429 = vsyncadd [#allocation5], 4294962176 }
  0x48   :  { %5430 = dma.done.wait [#allocation8], 32  }
  0x49   :  { %5431 = vsyncadd [#allocation8], 4294967264  ;;  %v4918_v0 = vld [vmem:[#allocation2 + $0x40] sm:$0xff]   ;;  %v4922_v4 = vld [vmem:[#allocation2 + $0x48] sm:$0xff]   ;;  %vm5445_vm0 = vmmov 0  }
  0x4a   :  { %v4919_v1 = vld [vmem:[#allocation2 + $0xc0] sm:$0xff]   ;;  %4430 = vmatprep.subr.bf16.mxu0 %v4918_v0  ;;  %v4923_v5 = vld [vmem:[#allocation2 + $0xc8] sm:$0xff]   ;;  %v4926_v8 = vld [vmem:[#allocation2 + $0x50] sm:$0xff]  }
  0x4b   :  { %v4920_v2 = vld [vmem:[#allocation2] sm:$0xff]   ;;  %4452 = vmatprep.subr.bf16.mxu1 %v4919_v1  ;;  %v4924_v6 = vld [vmem:[#allocation2 + $0x8] sm:$0xff]   ;;  %v4927_v9 = vld [vmem:[#allocation2 + $0xd0] sm:$0xff]  }
  0x4c   :  { %v4921_v3 = vld [vmem:[#allocation2 + $0x80] sm:$0xff]   ;;  %4431 = vmatpush3.bf16.msra.mxu0 %v4920_v2  ;;  %v4925_v7 = vld [vmem:[#allocation2 + $0x88] sm:$0xff]   ;;  %v4928_v10 = vld [vmem:[#allocation2 + $0x10] sm:$0xff]  }
  0x4d   :  { %4453 = vmatpush3.bf16.msra.mxu1 %v4921_v3  ;;  %4432 = vmatprep.subr.bf16.mxu0 %v4922_v4  ;;  %v4929_v11 = vld [vmem:[#allocation2 + $0x90] sm:$0xff]   ;;  %v4930_v12 = vld [vmem:[#allocation2 + $0x58] sm:$0xff]   ;;  %v4934_v16 = vld [vmem:[#allocation2 + $0x60] sm:$0xff]  }
  0x4e   :  { %4454 = vmatprep.subr.bf16.mxu1 %v4923_v5  ;;  %v4931_v13 = vld [vmem:[#allocation2 + $0xd8] sm:$0xff]   ;;  %v4935_v17 = vld [vmem:[#allocation2 + $0xe0] sm:$0xff]   ;;  %v4938_v20 = vld [vmem:[#allocation2 + $0x68] sm:$0xff]  }
  0x4f   :  { %v4932_v14 = vld [vmem:[#allocation2 + $0x18] sm:$0xff]   ;;  %v4936_v18 = vld [vmem:[#allocation2 + $0x20] sm:$0xff]   ;;  %v4939_v21 = vld [vmem:[#allocation2 + $0xe8] sm:$0xff]  }
  0x50   :  { %4433 = vmatpush3.bf16.msra.mxu0 %v4924_v6  ;;  %v4933_v15 = vld [vmem:[#allocation2 + $0x98] sm:$0xff]   ;;  %v4937_v19 = vld [vmem:[#allocation2 + $0xa0] sm:$0xff]   ;;  %v4940_v22 = vld [vmem:[#allocation2 + $0x28] sm:$0xff]  }
  0x51   :  { %4455 = vmatpush3.bf16.msra.mxu1 %v4925_v7  ;;  %4434 = vmatprep.subr.bf16.mxu0 %v4926_v8  ;;  %v4941_v23 = vld [vmem:[#allocation2 + $0xa8] sm:$0xff]   ;;  %v4942_v24 = vld [vmem:[#allocation2 + $0x70] sm:$0xff]   ;;  %v4946_v28 = vld [vmem:[#allocation2 + $0x78] sm:$0xff]  }
  0x52   :  { %4456 = vmatprep.subr.bf16.mxu1 %v4927_v9  ;;  %v4943_v25 = vld [vmem:[#allocation2 + $0xf0] sm:$0xff]   ;;  %v4947_v29 = vld [vmem:[#allocation2 + $0xf8] sm:$0xff]   ;;  %v77_v32 = vld [vmem:[%s5610_s0] sm:$0xff] }
  0x53   :  { %v4944_v26 = vld [vmem:[#allocation2 + $0x30] sm:$0xff]   ;;  %v4948_v30 = vld [vmem:[#allocation2 + $0x38] sm:$0xff]   ;;  %v78_v33 = vld [vmem:[%s5610_s0 + $0x8] sm:$0xff]  ;;  %v4028_v34 = vcombine.low %v77_v32, %v77_v32  ;;  %v4029_v35 = vcombine.high %v77_v32, %v77_v32 }
  0x54   :  { %4435 = vmatpush3.bf16.msra.mxu0 %v4928_v10  ;;  %v4945_v27 = vld [vmem:[#allocation2 + $0xb0] sm:$0xff]   ;;  %v4949_v31 = vld [vmem:[#allocation2 + $0xb8] sm:$0xff]   ;;  %v4030_v36 = vcombine.low %v78_v33, %v78_v33  ;;  %v4031_v37 = vcombine.high %v78_v33, %v78_v33  ;;  %v4954_v38 = vld [vmem:[#allocation2 + $0x140] sm:$0xff]  }
  0x55   :  { %4457 = vmatpush3.bf16.msra.mxu1 %v4929_v11  ;;  %4436 = vmatprep.subr.bf16.mxu0 %v4930_v12  ;;  %v4955_v39 = vld [vmem:[#allocation2 + $0x1c0] sm:$0xff]   ;;  %v4958_v42 = vld [vmem:[#allocation2 + $0x148] sm:$0xff]   ;;  %v4962_v46 = vld [vmem:[#allocation2 + $0x150] sm:$0xff]  }
  0x56   :  { %4458 = vmatprep.subr.bf16.mxu1 %v4931_v13  ;;  %2834 = vmatprep.mubr.bf16.mxu0 %v4029_v35  ;;  %v4956_v40 = vld [vmem:[#allocation2 + $0x100] sm:$0xff]   ;;  %v4959_v43 = vld [vmem:[#allocation2 + $0x1c8] sm:$0xff]   ;;  %v4963_v47 = vld [vmem:[#allocation2 + $0x1d0] sm:$0xff]  }
  0x57   :  { %2874 = vmatprep.mubr.bf16.mxu1 %v4031_v37  ;;  %v4957_v41 = vld [vmem:[#allocation2 + $0x180] sm:$0xff]   ;;  %v4960_v44 = vld [vmem:[#allocation2 + $0x108] sm:$0xff]   ;;  %v4964_v48 = vld [vmem:[#allocation2 + $0x110] sm:$0xff]  }
  0x58   :  { %4437 = vmatpush3.bf16.msra.mxu0 %v4932_v14  ;;  %v4961_v45 = vld [vmem:[#allocation2 + $0x188] sm:$0xff]   ;;  %v4965_v49 = vld [vmem:[#allocation2 + $0x190] sm:$0xff]   ;;  %v4966_v50 = vld [vmem:[#allocation2 + $0x158] sm:$0xff]  }
  0x59   :  { %4459 = vmatpush3.bf16.msra.mxu1 %v4933_v15  ;;  %4438 = vmatprep.subr.bf16.mxu0 %v4934_v16  ;;  %v4967_v51 = vld [vmem:[#allocation2 + $0x1d8] sm:$0xff]   ;;  %v4970_v54 = vld [vmem:[#allocation2 + $0x160] sm:$0xff]   ;;  %v4974_v58 = vld [vmem:[#allocation2 + $0x168] sm:$0xff]  }
  0x5a   :  { %4460 = vmatprep.subr.bf16.mxu1 %v4935_v17  ;;  %v4968_v52 = vld [vmem:[#allocation2 + $0x118] sm:$0xff]   ;;  %v4971_v55 = vld [vmem:[#allocation2 + $0x1e0] sm:$0xff]   ;;  %v4975_v59 = vld [vmem:[#allocation2 + $0x1e8] sm:$0xff]  }
  0x5b   :  { %v4969_v53 = vld [vmem:[#allocation2 + $0x198] sm:$0xff]   ;;  %v4972_v56 = vld [vmem:[#allocation2 + $0x120] sm:$0xff]   ;;  %v4976_v60 = vld [vmem:[#allocation2 + $0x128] sm:$0xff]  }
  0x5c   :  { %4439 = vmatpush3.bf16.msra.mxu0 %v4936_v18  ;;  %v4973_v57 = vld [vmem:[#allocation2 + $0x1a0] sm:$0xff]   ;;  %v4977_v61 = vld [vmem:[#allocation2 + $0x1a8] sm:$0xff]   ;;  %v4978_v62 = vld [vmem:[#allocation2 + $0x170] sm:$0xff]  }
  0x5d   :  { %4461 = vmatpush3.bf16.msra.mxu1 %v4937_v19  ;;  %4440 = vmatprep.subr.bf16.mxu0 %v4938_v20  ;;  %v4979_v63 = vld [vmem:[#allocation2 + $0x1f0] sm:$0xff]   ;;  %v4982_v2 = vld [vmem:[#allocation2 + $0x178] sm:$0xff]   ;;  %v4990_v12 = vld [vmem:[#allocation2 + $0x240] sm:$0xff]  }
  0x5e   :  { %4462 = vmatprep.subr.bf16.mxu1 %v4939_v21  ;;  %v4980_v0 = vld [vmem:[#allocation2 + $0x130] sm:$0xff]   ;;  %v4983_v3 = vld [vmem:[#allocation2 + $0x1f8] sm:$0xff]   ;;  %v4991_v13 = vld [vmem:[#allocation2 + $0x2c0] sm:$0xff]  }
  0x5f   :  { %v4981_v1 = vld [vmem:[#allocation2 + $0x1b0] sm:$0xff]   ;;  %v4984_v4 = vld [vmem:[#allocation2 + $0x138] sm:$0xff]   ;;  %v4992_v14 = vld [vmem:[#allocation2 + $0x200] sm:$0xff]  }
  0x60   :  { %4441 = vmatpush3.bf16.msra.mxu0 %v4940_v22  ;;  %v4985_v5 = vld [vmem:[#allocation2 + $0x1b8] sm:$0xff]   ;;  %v79_v6 = vld [vmem:[%s5610_s0 + $0x10] sm:$0xff]  ;;  %v4993_v15 = vld [vmem:[#allocation2 + $0x280] sm:$0xff]  }
  0x61   :  { %4463 = vmatpush3.bf16.msra.mxu1 %v4941_v23  ;;  %4442 = vmatprep.subr.bf16.mxu0 %v4942_v24  ;;  %v4032_v7 = vcombine.low %v79_v6, %v79_v6  ;;  %v4033_v8 = vcombine.high %v79_v6, %v79_v6  ;;  %v80_v9 = vld [vmem:[%s5610_s0 + $0x18] sm:$0xff]  ;;  %v4994_v16 = vld [vmem:[#allocation2 + $0x248] sm:$0xff]   ;;  %v4998_v20 = vld [vmem:[#allocation2 + $0x250] sm:$0xff]  }
  0x62   :  { %4464 = vmatprep.subr.bf16.mxu1 %v4943_v25  ;;  %v4034_v10 = vcombine.low %v80_v9, %v80_v9  ;;  %v4035_v11 = vcombine.high %v80_v9, %v80_v9  ;;  %v4995_v17 = vld [vmem:[#allocation2 + $0x2c8] sm:$0xff]   ;;  %v4999_v21 = vld [vmem:[#allocation2 + $0x2d0] sm:$0xff]   ;;  %v5002_v24 = vld [vmem:[#allocation2 + $0x258] sm:$0xff]  }
  0x63   :  { %v4996_v18 = vld [vmem:[#allocation2 + $0x208] sm:$0xff]   ;;  %v5000_v22 = vld [vmem:[#allocation2 + $0x210] sm:$0xff]   ;;  %v5003_v25 = vld [vmem:[#allocation2 + $0x2d8] sm:$0xff]  }
  0x64   :  { %4443 = vmatpush3.bf16.msra.mxu0 %v4944_v26  ;;  %v4997_v19 = vld [vmem:[#allocation2 + $0x288] sm:$0xff]   ;;  %v5001_v23 = vld [vmem:[#allocation2 + $0x290] sm:$0xff]   ;;  %v5004_v26 = vld [vmem:[#allocation2 + $0x218] sm:$0xff]  }
  0x65   :  { %4465 = vmatpush3.bf16.msra.mxu1 %v4945_v27  ;;  %4444 = vmatprep.subr.bf16.mxu0 %v4946_v28  ;;  %v5005_v27 = vld [vmem:[#allocation2 + $0x298] sm:$0xff]   ;;  %v5006_v28 = vld [vmem:[#allocation2 + $0x260] sm:$0xff]   ;;  %v5010_v32 = vld [vmem:[#allocation2 + $0x268] sm:$0xff]  }
  0x66   :  { %4466 = vmatprep.subr.bf16.mxu1 %v4947_v29  ;;  %v5007_v29 = vld [vmem:[#allocation2 + $0x2e0] sm:$0xff]   ;;  %v5011_v33 = vld [vmem:[#allocation2 + $0x2e8] sm:$0xff]   ;;  %v5015_v37 = vld [vmem:[#allocation2 + $0x2f0] sm:$0xff]  }
  0x67   :  { %v5013_v35 = vld [vmem:[#allocation2 + $0x2a8] sm:$0xff]  }
  0x68   :  { %4445 = vmatpush3.bf16.msra.mxu0 %v4948_v30  ;;  %v5008_v30 = vld [vmem:[#allocation2 + $0x220] sm:$0xff]   ;;  %v5046_v6 = vld [vmem:[#allocation2 + $0x368] sm:$0xff]  }
  0x69   :  { %4467 = vmatpush3.bf16.msra.mxu1 %v4949_v31  ;;  %4474 = vmatprep.subr.bf16.mxu0 %v4954_v38  ;;  %v5009_v31 = vld [vmem:[#allocation2 + $0x2a0] sm:$0xff]   ;;  %v5016_v38 = vld [vmem:[#allocation2 + $0x230] sm:$0xff]   ;;  %v5049_v9 = vld [vmem:[#allocation2 + $0x3a8] sm:$0xff]  }
  0x6a   :  { %4496 = vmatprep.subr.bf16.mxu1 %v4955_v39  ;;  %v5017_v39 = vld [vmem:[#allocation2 + $0x2b0] sm:$0xff]  }
  0x6b   :  { %2835 = vmatmul.mubr.bf16.vlgmr.msra.gmra.mrb[0].mxu0 %v4028_v34  ;;  %v5012_v34 = vld [vmem:[#allocation2 + $0x228] sm:$0xff]  }
  0x6c   :  { %2875 = vmatmul.mubr.bf16.vlgmr.msra.gmra.mrb[0].mxu1 %v4030_v36  ;;  %4475 = vmatpush3.bf16.msra.mxu0 %v4956_v40  ;;  %v5014_v36 = vld [vmem:[#allocation2 + $0x270] sm:$0xff]   ;;  %v5018_v40 = vld [vmem:[#allocation2 + $0x278] sm:$0xff]  }
  0x6d   :  { %4497 = vmatpush3.bf16.msra.mxu1 %v4957_v41  ;;  %4476 = vmatprep.subr.bf16.mxu0 %v4958_v42  ;;  %v5019_v41 = vld [vmem:[#allocation2 + $0x2f8] sm:$0xff]  }
  0x6e   :  { %4498 = vmatprep.subr.bf16.mxu1 %v4959_v43  ;;  %2914 = vmatprep.mubr.bf16.mxu0 %v4033_v8  ;;  %v5020_v42 = vld [vmem:[#allocation2 + $0x238] sm:$0xff]   ;;  %v5048_v8 = vld [vmem:[#allocation2 + $0x328] sm:$0xff]  }
  0x6f   :  { %2954 = vmatprep.mubr.bf16.mxu1 %v4035_v11  ;;  %v5021_v43 = vld [vmem:[#allocation2 + $0x2b8] sm:$0xff]   ;;  %v5051_v11 = vld [vmem:[#allocation2 + $0x3f0] sm:$0xff]  }
  0x70   :  { %4477 = vmatpush3.bf16.msra.mxu0 %v4960_v44  ;;  %v81_v44 = vld [vmem:[%s5610_s0 + $0x20] sm:$0xff] }
  0x71   :  { %4499 = vmatpush3.bf16.msra.mxu1 %v4961_v45  ;;  %4478 = vmatprep.subr.bf16.mxu0 %v4962_v46  ;;  %v82_v45 = vld [vmem:[%s5610_s0 + $0x28] sm:$0xff]  ;;  %v4036_v46 = vcombine.low %v81_v44, %v81_v44 }
  0x72   :  { %4500 = vmatprep.subr.bf16.mxu1 %v4963_v47  ;;  %v4037_v47 = vcombine.high %v81_v44, %v81_v44  ;;  %v5082_v44 = vld [vmem:[#allocation2 + $0x468] sm:$0xff]  }
  0x74   :  { %4479 = vmatpush3.bf16.msra.mxu0 %v4964_v48  ;;  %v4038_v48 = vcombine.low %v82_v45, %v82_v45 }
  0x75   :  { %4501 = vmatpush3.bf16.msra.mxu1 %v4965_v49  ;;  %4480 = vmatprep.subr.bf16.mxu0 %v4966_v50  ;;  %v4039_v49 = vcombine.high %v82_v45, %v82_v45  ;;  %v5026_v50 = vld [vmem:[#allocation2 + $0x340] sm:$0xff]   ;;  %v5083_v45 = vld [vmem:[#allocation2 + $0x4e8] sm:$0xff]  }
  0x76   :  { %4502 = vmatprep.subr.bf16.mxu1 %v4967_v51  ;;  %v5027_v51 = vld [vmem:[#allocation2 + $0x3c0] sm:$0xff]  }
  0x78   :  { %4481 = vmatpush3.bf16.msra.mxu0 %v4968_v52  ;;  %v5028_v52 = vld [vmem:[#allocation2 + $0x300] sm:$0xff]  }
  0x79   :  { %4503 = vmatpush3.bf16.msra.mxu1 %v4969_v53  ;;  %4482 = vmatprep.subr.bf16.mxu0 %v4970_v54  ;;  %v5029_v53 = vld [vmem:[#allocation2 + $0x380] sm:$0xff]   ;;  %v5030_v54 = vld [vmem:[#allocation2 + $0x348] sm:$0xff]  }
  0x7a   :  { %4504 = vmatprep.subr.bf16.mxu1 %v4971_v55  ;;  %v5031_v55 = vld [vmem:[#allocation2 + $0x3c8] sm:$0xff]  }
  0x7c   :  { %4483 = vmatpush3.bf16.msra.mxu0 %v4972_v56  ;;  %v5032_v56 = vld [vmem:[#allocation2 + $0x308] sm:$0xff]  }
  0x7d   :  { %4505 = vmatpush3.bf16.msra.mxu1 %v4973_v57  ;;  %4484 = vmatprep.subr.bf16.mxu0 %v4974_v58  ;;  %v5033_v57 = vld [vmem:[#allocation2 + $0x388] sm:$0xff]   ;;  %v5034_v58 = vld [vmem:[#allocation2 + $0x350] sm:$0xff]  }
  0x7e   :  { %4506 = vmatprep.subr.bf16.mxu1 %v4975_v59  ;;  %v5035_v59 = vld [vmem:[#allocation2 + $0x3d0] sm:$0xff]  }
  0x80   :  { %4485 = vmatpush3.bf16.msra.mxu0 %v4976_v60  ;;  %v5036_v60 = vld [vmem:[#allocation2 + $0x310] sm:$0xff]  }
  0x81   :  { %4507 = vmatpush3.bf16.msra.mxu1 %v4977_v61  ;;  %4486 = vmatprep.subr.bf16.mxu0 %v4978_v62  ;;  %v5037_v61 = vld [vmem:[#allocation2 + $0x390] sm:$0xff]   ;;  %v5038_v62 = vld [vmem:[#allocation2 + $0x358] sm:$0xff]  }
  0x82   :  { %4508 = vmatprep.subr.bf16.mxu1 %v4979_v63  ;;  %v5039_v63 = vld [vmem:[#allocation2 + $0x3d8] sm:$0xff]  }
  0x84   :  { %4487 = vmatpush3.bf16.msra.mxu0 %v4980_v0  ;;  %v5040_v0 = vld [vmem:[#allocation2 + $0x318] sm:$0xff]  }
  0x85   :  { %4509 = vmatpush3.bf16.msra.mxu1 %v4981_v1  ;;  %4488 = vmatprep.subr.bf16.mxu0 %v4982_v2  ;;  %v5041_v1 = vld [vmem:[#allocation2 + $0x398] sm:$0xff]   ;;  %v5042_v2 = vld [vmem:[#allocation2 + $0x360] sm:$0xff]  }
  0x86   :  { %4510 = vmatprep.subr.bf16.mxu1 %v4983_v3  ;;  %v5043_v3 = vld [vmem:[#allocation2 + $0x3e0] sm:$0xff]  }
  0x88   :  { %4489 = vmatpush3.bf16.msra.mxu0 %v4984_v4  ;;  %v5044_v4 = vld [vmem:[#allocation2 + $0x320] sm:$0xff]  }
  0x89   :  { %4511 = vmatpush3.bf16.msra.mxu1 %v4985_v5  ;;  %4518 = vmatprep.subr.bf16.mxu0 %v4990_v12  ;;  %v5045_v5 = vld [vmem:[#allocation2 + $0x3a0] sm:$0xff]   ;;  %v5052_v12 = vld [vmem:[#allocation2 + $0x330] sm:$0xff]  }
  0x8a   :  { %4540 = vmatprep.subr.bf16.mxu1 %v4991_v13  ;;  %v5053_v13 = vld [vmem:[#allocation2 + $0x3b0] sm:$0xff]  }
  0x8b   :  { %2915 = vmatmul.mubr.bf16.vlgmr.msra.gmra.mrb[4].mxu0 %v4032_v7  ;;  %v5047_v7 = vld [vmem:[#allocation2 + $0x3e8] sm:$0xff]  }
  0x8c   :  { %2955 = vmatmul.mubr.bf16.vlgmr.msra.gmra.mrb[4].mxu1 %v4034_v10  ;;  %4519 = vmatpush3.bf16.msra.mxu0 %v4992_v14  ;;  %v5050_v10 = vld [vmem:[#allocation2 + $0x370] sm:$0xff]   ;;  %v5054_v14 = vld [vmem:[#allocation2 + $0x378] sm:$0xff]  }
  0x8d   :  { %4541 = vmatpush3.bf16.msra.mxu1 %v4993_v15  ;;  %4520 = vmatprep.subr.bf16.mxu0 %v4994_v16  ;;  %v5055_v15 = vld [vmem:[#allocation2 + $0x3f8] sm:$0xff]  }
  0x8e   :  { %4542 = vmatprep.subr.bf16.mxu1 %v4995_v17  ;;  %2994 = vmatprep.mubr.bf16.mxu0 %v4037_v47  ;;  %v5056_v16 = vld [vmem:[#allocation2 + $0x338] sm:$0xff]   ;;  %v5085_v47 = vld [vmem:[#allocation2 + $0x4a8] sm:$0xff]  }
  0x8f   :  { %3034 = vmatprep.mubr.bf16.mxu1 %v4039_v49  ;;  %v5057_v17 = vld [vmem:[#allocation2 + $0x3b8] sm:$0xff]   ;;  %v5087_v49 = vld [vmem:[#allocation2 + $0x4f0] sm:$0xff]  }
  0x90   :  { %4521 = vmatpush3.bf16.msra.mxu0 %v4996_v18  ;;  %v83_v18 = vld [vmem:[%s5610_s0 + $0x30] sm:$0xff] }
  0x91   :  { %4543 = vmatpush3.bf16.msra.mxu1 %v4997_v19  ;;  %4522 = vmatprep.subr.bf16.mxu0 %v4998_v20  ;;  %v84_v19 = vld [vmem:[%s5610_s0 + $0x38] sm:$0xff]  ;;  %v4040_v20 = vcombine.low %v83_v18, %v83_v18 }
  0x92   :  { %4544 = vmatprep.subr.bf16.mxu1 %v4999_v21  ;;  %v4041_v21 = vcombine.high %v83_v18, %v83_v18  ;;  %v5118_v18 = vld [vmem:[#allocation2 + $0x568] sm:$0xff]  }
  0x94   :  { %4523 = vmatpush3.bf16.msra.mxu0 %v5000_v22  ;;  %v4042_v22 = vcombine.low %v84_v19, %v84_v19 }
  0x95   :  { %4545 = vmatpush3.bf16.msra.mxu1 %v5001_v23  ;;  %4524 = vmatprep.subr.bf16.mxu0 %v5002_v24  ;;  %v5062_v23 = vld [vmem:[#allocation2 + $0x440] sm:$0xff]   ;;  %v4043_v24 = vcombine.high %v84_v19, %v84_v19  ;;  %v5119_v19 = vld [vmem:[#allocation2 + $0x5e8] sm:$0xff]  }
  0x96   :  { %4546 = vmatprep.subr.bf16.mxu1 %v5003_v25  ;;  %v5063_v25 = vld [vmem:[#allocation2 + $0x4c0] sm:$0xff]  }
  0x98   :  { %4525 = vmatpush3.bf16.msra.mxu0 %v5004_v26  ;;  %v5064_v26 = vld [vmem:[#allocation2 + $0x400] sm:$0xff]  }
  0x99   :  { %4547 = vmatpush3.bf16.msra.mxu1 %v5005_v27  ;;  %4526 = vmatprep.subr.bf16.mxu0 %v5006_v28  ;;  %v5065_v27 = vld [vmem:[#allocation2 + $0x480] sm:$0xff]   ;;  %v5066_v28 = vld [vmem:[#allocation2 + $0x448] sm:$0xff]  }
  0x9a   :  { %4548 = vmatprep.subr.bf16.mxu1 %v5007_v29  ;;  %v5067_v29 = vld [vmem:[#allocation2 + $0x4c8] sm:$0xff]  }
  0x9c   :  { %4527 = vmatpush3.bf16.msra.mxu0 %v5008_v30  ;;  %v5068_v30 = vld [vmem:[#allocation2 + $0x408] sm:$0xff]  }
  0x9d   :  { %4549 = vmatpush3.bf16.msra.mxu1 %v5009_v31  ;;  %4528 = vmatprep.subr.bf16.mxu0 %v5010_v32  ;;  %v5069_v31 = vld [vmem:[#allocation2 + $0x488] sm:$0xff]   ;;  %v5070_v32 = vld [vmem:[#allocation2 + $0x450] sm:$0xff]  }
  0x9e   :  { %4550 = vmatprep.subr.bf16.mxu1 %v5011_v33  ;;  %v5071_v33 = vld [vmem:[#allocation2 + $0x4d0] sm:$0xff]  }
  0xa0   :  { %4529 = vmatpush3.bf16.msra.mxu0 %v5012_v34  ;;  %v5072_v34 = vld [vmem:[#allocation2 + $0x410] sm:$0xff]  }
  0xa1   :  { %4551 = vmatpush3.bf16.msra.mxu1 %v5013_v35  ;;  %4530 = vmatprep.subr.bf16.mxu0 %v5014_v36  ;;  %v5073_v35 = vld [vmem:[#allocation2 + $0x490] sm:$0xff]   ;;  %v5074_v36 = vld [vmem:[#allocation2 + $0x458] sm:$0xff]  }
  0xa2   :  { %4552 = vmatprep.subr.bf16.mxu1 %v5015_v37  ;;  %v5075_v37 = vld [vmem:[#allocation2 + $0x4d8] sm:$0xff]  }
  0xa4   :  { %4531 = vmatpush3.bf16.msra.mxu0 %v5016_v38  ;;  %v5076_v38 = vld [vmem:[#allocation2 + $0x418] sm:$0xff]  }
  0xa5   :  { %4553 = vmatpush3.bf16.msra.mxu1 %v5017_v39  ;;  %4532 = vmatprep.subr.bf16.mxu0 %v5018_v40  ;;  %v5077_v39 = vld [vmem:[#allocation2 + $0x498] sm:$0xff]   ;;  %v5078_v40 = vld [vmem:[#allocation2 + $0x460] sm:$0xff]  }
  0xa6   :  { %4554 = vmatprep.subr.bf16.mxu1 %v5019_v41  ;;  %v5079_v41 = vld [vmem:[#allocation2 + $0x4e0] sm:$0xff]  }
  0xa8   :  { %4533 = vmatpush3.bf16.msra.mxu0 %v5020_v42  ;;  %v5080_v42 = vld [vmem:[#allocation2 + $0x420] sm:$0xff]  }
  0xa9   :  { %4555 = vmatpush3.bf16.msra.mxu1 %v5021_v43  ;;  %4562 = vmatprep.subr.bf16.mxu0 %v5026_v50  ;;  %v5081_v43 = vld [vmem:[#allocation2 + $0x4a0] sm:$0xff]   ;;  %v5088_v50 = vld [vmem:[#allocation2 + $0x430] sm:$0xff]  }
  0xaa   :  { %4584 = vmatprep.subr.bf16.mxu1 %v5027_v51  ;;  %v5089_v51 = vld [vmem:[#allocation2 + $0x4b0] sm:$0xff]  }
  0xab   :  { %2995 = vmatmul.mubr.bf16.vlgmr.msra.gmra.mrb[8].mxu0 %v4036_v46  ;;  %v5084_v46 = vld [vmem:[#allocation2 + $0x428] sm:$0xff]  }
  0xac   :  { %3035 = vmatmul.mubr.bf16.vlgmr.msra.gmra.mrb[8].mxu1 %v4038_v48  ;;  %4563 = vmatpush3.bf16.msra.mxu0 %v5028_v52  ;;  %v5086_v48 = vld [vmem:[#allocation2 + $0x470] sm:$0xff]   ;;  %v5090_v52 = vld [vmem:[#allocation2 + $0x478] sm:$0xff]  }
  0xad   :  { %4585 = vmatpush3.bf16.msra.mxu1 %v5029_v53  ;;  %4564 = vmatprep.subr.bf16.mxu0 %v5030_v54  ;;  %v5091_v53 = vld [vmem:[#allocation2 + $0x4f8] sm:$0xff]  }
  0xae   :  { %4586 = vmatprep.subr.bf16.mxu1 %v5031_v55  ;;  %3074 = vmatprep.mubr.bf16.mxu0 %v4041_v21  ;;  %v5092_v54 = vld [vmem:[#allocation2 + $0x438] sm:$0xff]   ;;  %v5121_v21 = vld [vmem:[#allocation2 + $0x5a8] sm:$0xff]  }
  0xaf   :  { %3114 = vmatprep.mubr.bf16.mxu1 %v4043_v24  ;;  %v5093_v55 = vld [vmem:[#allocation2 + $0x4b8] sm:$0xff]   ;;  %v5124_v24 = vld [vmem:[#allocation2 + $0x530] sm:$0xff]  }
  0xb0   :  { %4565 = vmatpush3.bf16.msra.mxu0 %v5032_v56  ;;  %v85_v56 = vld [vmem:[%s5610_s0 + $0x40] sm:$0xff] }
  0xb1   :  { %4587 = vmatpush3.bf16.msra.mxu1 %v5033_v57  ;;  %4566 = vmatprep.subr.bf16.mxu0 %v5034_v58  ;;  %v4044_v57 = vcombine.low %v85_v56, %v85_v56  ;;  %v4045_v58 = vcombine.high %v85_v56, %v85_v56  ;;  %v5154_v56 = vld [vmem:[#allocation2 + $0x668] sm:$0xff]  }
  0xb2   :  { %4588 = vmatprep.subr.bf16.mxu1 %v5035_v59  ;;  %v86_v59 = vld [vmem:[%s5610_s0 + $0x48] sm:$0xff] }
  0xb4   :  { %4567 = vmatpush3.bf16.msra.mxu0 %v5036_v60  ;;  %v4046_v60 = vcombine.low %v86_v59, %v86_v59 }
  0xb5   :  { %4589 = vmatpush3.bf16.msra.mxu1 %v5037_v61  ;;  %4568 = vmatprep.subr.bf16.mxu0 %v5038_v62  ;;  %v4047_v61 = vcombine.high %v86_v59, %v86_v59  ;;  %v5098_v62 = vld [vmem:[#allocation2 + $0x540] sm:$0xff]   ;;  %v5157_v59 = vld [vmem:[#allocation2 + $0x6a8] sm:$0xff]  }
  0xb6   :  { %4590 = vmatprep.subr.bf16.mxu1 %v5039_v63  ;;  %v5099_v63 = vld [vmem:[#allocation2 + $0x5c0] sm:$0xff]  }
  0xb8   :  { %4569 = vmatpush3.bf16.msra.mxu0 %v5040_v0  ;;  %v5100_v0 = vld [vmem:[#allocation2 + $0x500] sm:$0xff]  }
  0xb9   :  { %4591 = vmatpush3.bf16.msra.mxu1 %v5041_v1  ;;  %4570 = vmatprep.subr.bf16.mxu0 %v5042_v2  ;;  %v5101_v1 = vld [vmem:[#allocation2 + $0x580] sm:$0xff]   ;;  %v5102_v2 = vld [vmem:[#allocation2 + $0x548] sm:$0xff]  }
  0xba   :  { %4592 = vmatprep.subr.bf16.mxu1 %v5043_v3  ;;  %v5103_v3 = vld [vmem:[#allocation2 + $0x5c8] sm:$0xff]  }
  0xbc   :  { %4571 = vmatpush3.bf16.msra.mxu0 %v5044_v4  ;;  %v5104_v4 = vld [vmem:[#allocation2 + $0x508] sm:$0xff]  }
  0xbd   :  { %4593 = vmatpush3.bf16.msra.mxu1 %v5045_v5  ;;  %4572 = vmatprep.subr.bf16.mxu0 %v5046_v6  ;;  %v5105_v5 = vld [vmem:[#allocation2 + $0x588] sm:$0xff]   ;;  %v5106_v6 = vld [vmem:[#allocation2 + $0x550] sm:$0xff]  }
  0xbe   :  { %4594 = vmatprep.subr.bf16.mxu1 %v5047_v7  ;;  %v5107_v7 = vld [vmem:[#allocation2 + $0x5d0] sm:$0xff]  }
  0xc0   :  { %4573 = vmatpush3.bf16.msra.mxu0 %v5048_v8  ;;  %v5108_v8 = vld [vmem:[#allocation2 + $0x510] sm:$0xff]  }
  0xc1   :  { %4595 = vmatpush3.bf16.msra.mxu1 %v5049_v9  ;;  %4574 = vmatprep.subr.bf16.mxu0 %v5050_v10  ;;  %v5109_v9 = vld [vmem:[#allocation2 + $0x590] sm:$0xff]   ;;  %v5110_v10 = vld [vmem:[#allocation2 + $0x558] sm:$0xff]  }
  0xc2   :  { %4596 = vmatprep.subr.bf16.mxu1 %v5051_v11  ;;  %v5111_v11 = vld [vmem:[#allocation2 + $0x5d8] sm:$0xff]  }
  0xc4   :  { %4575 = vmatpush3.bf16.msra.mxu0 %v5052_v12  ;;  %v5112_v12 = vld [vmem:[#allocation2 + $0x518] sm:$0xff]  }
  0xc5   :  { %4597 = vmatpush3.bf16.msra.mxu1 %v5053_v13  ;;  %4576 = vmatprep.subr.bf16.mxu0 %v5054_v14  ;;  %v5113_v13 = vld [vmem:[#allocation2 + $0x598] sm:$0xff]   ;;  %v5114_v14 = vld [vmem:[#allocation2 + $0x560] sm:$0xff]  }
  0xc6   :  { %4598 = vmatprep.subr.bf16.mxu1 %v5055_v15  ;;  %v5115_v15 = vld [vmem:[#allocation2 + $0x5e0] sm:$0xff]  }
  0xc8   :  { %4577 = vmatpush3.bf16.msra.mxu0 %v5056_v16  ;;  %v5116_v16 = vld [vmem:[#allocation2 + $0x520] sm:$0xff]  }
  0xc9   :  { %4599 = vmatpush3.bf16.msra.mxu1 %v5057_v17  ;;  %4606 = vmatprep.subr.bf16.mxu0 %v5062_v23  ;;  %v5117_v17 = vld [vmem:[#allocation2 + $0x5a0] sm:$0xff]   ;;  %v5123_v23 = vld [vmem:[#allocation2 + $0x5f0] sm:$0xff]  }
  0xca   :  { %4628 = vmatprep.subr.bf16.mxu1 %v5063_v25  ;;  %v5125_v25 = vld [vmem:[#allocation2 + $0x5b0] sm:$0xff]  }
  0xcb   :  { %3075 = vmatmul.mubr.bf16.vlgmr.msra.gmra.mrb[12].mxu0 %v4040_v20  ;;  %v5120_v20 = vld [vmem:[#allocation2 + $0x528] sm:$0xff]  }
  0xcc   :  { %3115 = vmatmul.mubr.bf16.vlgmr.msra.gmra.mrb[12].mxu1 %v4042_v22  ;;  %4607 = vmatpush3.bf16.msra.mxu0 %v5064_v26  ;;  %v5122_v22 = vld [vmem:[#allocation2 + $0x570] sm:$0xff]   ;;  %v5126_v26 = vld [vmem:[#allocation2 + $0x578] sm:$0xff]  }
  0xcd   :  { %4629 = vmatpush3.bf16.msra.mxu1 %v5065_v27  ;;  %4608 = vmatprep.subr.bf16.mxu0 %v5066_v28  ;;  %v5127_v27 = vld [vmem:[#allocation2 + $0x5f8] sm:$0xff]  }
  0xce   :  { %4630 = vmatprep.subr.bf16.mxu1 %v5067_v29  ;;  %3154 = vmatprep.mubr.bf16.mxu0 %v4045_v58  ;;  %v5128_v28 = vld [vmem:[#allocation2 + $0x538] sm:$0xff]   ;;  %v5156_v58 = vld [vmem:[#allocation2 + $0x628] sm:$0xff]  }
  0xcf   :  { %3194 = vmatprep.mubr.bf16.mxu1 %v4047_v61  ;;  %v5129_v29 = vld [vmem:[#allocation2 + $0x5b8] sm:$0xff]   ;;  %v5159_v61 = vld [vmem:[#allocation2 + $0x6f0] sm:$0xff]  }
  0xd0   :  { %4609 = vmatpush3.bf16.msra.mxu0 %v5068_v30  ;;  %v87_v30 = vld [vmem:[%s5610_s0 + $0x50] sm:$0xff] }
  0xd1   :  { %4631 = vmatpush3.bf16.msra.mxu1 %v5069_v31  ;;  %4610 = vmatprep.subr.bf16.mxu0 %v5070_v32  ;;  %v88_v31 = vld [vmem:[%s5610_s0 + $0x58] sm:$0xff]  ;;  %v4048_v32 = vcombine.low %v87_v30, %v87_v30 }
  0xd2   :  { %4632 = vmatprep.subr.bf16.mxu1 %v5071_v33  ;;  %v4049_v33 = vcombine.high %v87_v30, %v87_v30  ;;  %v5189_v30 = vld [vmem:[#allocation2 + $0x7a0] sm:$0xff]  }
  0xd4   :  { %4611 = vmatpush3.bf16.msra.mxu0 %v5072_v34  ;;  %v4050_v34 = vcombine.low %v88_v31, %v88_v31 }
  0xd5   :  { %4633 = vmatpush3.bf16.msra.mxu1 %v5073_v35  ;;  %4612 = vmatprep.subr.bf16.mxu0 %v5074_v36  ;;  %v4051_v35 = vcombine.high %v88_v31, %v88_v31  ;;  %v5134_v36 = vld [vmem:[#allocation2 + $0x640] sm:$0xff]  }
  0xd6   :  { %4634 = vmatprep.subr.bf16.mxu1 %v5075_v37  ;;  %v5135_v37 = vld [vmem:[#allocation2 + $0x6c0] sm:$0xff]  }
  0xd8   :  { %4613 = vmatpush3.bf16.msra.mxu0 %v5076_v38  ;;  %v5136_v38 = vld [vmem:[#allocation2 + $0x600] sm:$0xff]  }
  0xd9   :  { %4635 = vmatpush3.bf16.msra.mxu1 %v5077_v39  ;;  %4614 = vmatprep.subr.bf16.mxu0 %v5078_v40  ;;  %v5137_v39 = vld [vmem:[#allocation2 + $0x680] sm:$0xff]   ;;  %v5138_v40 = vld [vmem:[#allocation2 + $0x648] sm:$0xff]  }
  0xda   :  { %4636 = vmatprep.subr.bf16.mxu1 %v5079_v41  ;;  %v5139_v41 = vld [vmem:[#allocation2 + $0x6c8] sm:$0xff]  }
  0xdc   :  { %4615 = vmatpush3.bf16.msra.mxu0 %v5080_v42  ;;  %v5140_v42 = vld [vmem:[#allocation2 + $0x608] sm:$0xff]  }
  0xdd   :  { %4637 = vmatpush3.bf16.msra.mxu1 %v5081_v43  ;;  %4616 = vmatprep.subr.bf16.mxu0 %v5082_v44  ;;  %v5141_v43 = vld [vmem:[#allocation2 + $0x688] sm:$0xff]   ;;  %v5142_v44 = vld [vmem:[#allocation2 + $0x650] sm:$0xff]  }
  0xde   :  { %4638 = vmatprep.subr.bf16.mxu1 %v5083_v45  ;;  %v5143_v45 = vld [vmem:[#allocation2 + $0x6d0] sm:$0xff]  }
  0xe0   :  { %4617 = vmatpush3.bf16.msra.mxu0 %v5084_v46  ;;  %v5144_v46 = vld [vmem:[#allocation2 + $0x610] sm:$0xff]  }
  0xe1   :  { %4639 = vmatpush3.bf16.msra.mxu1 %v5085_v47  ;;  %4618 = vmatprep.subr.bf16.mxu0 %v5086_v48  ;;  %v5145_v47 = vld [vmem:[#allocation2 + $0x690] sm:$0xff]   ;;  %v5146_v48 = vld [vmem:[#allocation2 + $0x658] sm:$0xff]  }
  0xe2   :  { %4640 = vmatprep.subr.bf16.mxu1 %v5087_v49  ;;  %v5147_v49 = vld [vmem:[#allocation2 + $0x6d8] sm:$0xff]  }
  0xe4   :  { %4619 = vmatpush3.bf16.msra.mxu0 %v5088_v50  ;;  %v5148_v50 = vld [vmem:[#allocation2 + $0x618] sm:$0xff]  }
  0xe5   :  { %4641 = vmatpush3.bf16.msra.mxu1 %v5089_v51  ;;  %4620 = vmatprep.subr.bf16.mxu0 %v5090_v52  ;;  %v5149_v51 = vld [vmem:[#allocation2 + $0x698] sm:$0xff]   ;;  %v5150_v52 = vld [vmem:[#allocation2 + $0x660] sm:$0xff]  }
  0xe6   :  { %4642 = vmatprep.subr.bf16.mxu1 %v5091_v53  ;;  %v5151_v53 = vld [vmem:[#allocation2 + $0x6e0] sm:$0xff]  }
  0xe8   :  { %4621 = vmatpush3.bf16.msra.mxu0 %v5092_v54  ;;  %v5152_v54 = vld [vmem:[#allocation2 + $0x620] sm:$0xff]  }
  0xe9   :  { %4643 = vmatpush3.bf16.msra.mxu1 %v5093_v55  ;;  %4650 = vmatprep.subr.bf16.mxu0 %v5098_v62  ;;  %v5153_v55 = vld [vmem:[#allocation2 + $0x6a0] sm:$0xff]   ;;  %v5160_v62 = vld [vmem:[#allocation2 + $0x630] sm:$0xff]  }
  0xea   :  { %4672 = vmatprep.subr.bf16.mxu1 %v5099_v63  ;;  %v5161_v63 = vld [vmem:[#allocation2 + $0x6b0] sm:$0xff]  }
  0xeb   :  { %3155 = vmatmul.mubr.bf16.vlgmr.msra.gmra.mrb[16].mxu0 %v4044_v57  ;;  %v5155_v57 = vld [vmem:[#allocation2 + $0x6e8] sm:$0xff]  }
  0xec   :  { %3195 = vmatmul.mubr.bf16.vlgmr.msra.gmra.mrb[16].mxu1 %v4046_v60  ;;  %4651 = vmatpush3.bf16.msra.mxu0 %v5100_v0  ;;  %v5158_v60 = vld [vmem:[#allocation2 + $0x670] sm:$0xff]   ;;  %v5162_v0 = vld [vmem:[#allocation2 + $0x678] sm:$0xff]  }
  0xed   :  { %4673 = vmatpush3.bf16.msra.mxu1 %v5101_v1  ;;  %4652 = vmatprep.subr.bf16.mxu0 %v5102_v2  ;;  %v5163_v1 = vld [vmem:[#allocation2 + $0x6f8] sm:$0xff]  }
  0xee   :  { %4674 = vmatprep.subr.bf16.mxu1 %v5103_v3  ;;  %3234 = vmatprep.mubr.bf16.mxu0 %v4049_v33  ;;  %v5164_v2 = vld [vmem:[#allocation2 + $0x638] sm:$0xff]  }
  0xef   :  { %3274 = vmatprep.mubr.bf16.mxu1 %v4051_v35  ;;  %v5165_v3 = vld [vmem:[#allocation2 + $0x6b8] sm:$0xff]  }
  0xf0   :  { %4653 = vmatpush3.bf16.msra.mxu0 %v5104_v4  ;;  %v89_v4 = vld [vmem:[%s5610_s0 + $0x60] sm:$0xff] }
  0xf1   :  { %4675 = vmatpush3.bf16.msra.mxu1 %v5105_v5  ;;  %4654 = vmatprep.subr.bf16.mxu0 %v5106_v6  ;;  %v90_v5 = vld [vmem:[%s5610_s0 + $0x68] sm:$0xff]  ;;  %v4052_v6 = vcombine.low %v89_v4, %v89_v4 }
  0xf2   :  { %4676 = vmatprep.subr.bf16.mxu1 %v5107_v7  ;;  %v4053_v7 = vcombine.high %v89_v4, %v89_v4  ;;  %v5213_v4 = vld [vmem:[#allocation2 + $0x888] sm:$0xff]  }
  0xf4   :  { %4655 = vmatpush3.bf16.msra.mxu0 %v5108_v8  ;;  %v4054_v8 = vcombine.low %v90_v5, %v90_v5 }
  0xf5   :  { %4677 = vmatpush3.bf16.msra.mxu1 %v5109_v9  ;;  %4656 = vmatprep.subr.bf16.mxu0 %v5110_v10  ;;  %v5170_v9 = vld [vmem:[#allocation2 + $0x740] sm:$0xff]   ;;  %v4055_v10 = vcombine.high %v90_v5, %v90_v5  ;;  %v5214_v5 = vld [vmem:[#allocation2 + $0x850] sm:$0xff]  }
  0xf6   :  { %4678 = vmatprep.subr.bf16.mxu1 %v5111_v11  ;;  %v5171_v11 = vld [vmem:[#allocation2 + $0x7c0] sm:$0xff]  }
  0xf8   :  { %4657 = vmatpush3.bf16.msra.mxu0 %v5112_v12  ;;  %v5172_v12 = vld [vmem:[#allocation2 + $0x700] sm:$0xff]  }
  0xf9   :  { %4679 = vmatpush3.bf16.msra.mxu1 %v5113_v13  ;;  %4658 = vmatprep.subr.bf16.mxu0 %v5114_v14  ;;  %v5173_v13 = vld [vmem:[#allocation2 + $0x780] sm:$0xff]   ;;  %v5174_v14 = vld [vmem:[#allocation2 + $0x748] sm:$0xff]  }
  0xfa   :  { %4680 = vmatprep.subr.bf16.mxu1 %v5115_v15  ;;  %v5175_v15 = vld [vmem:[#allocation2 + $0x7c8] sm:$0xff]  }
  0xfc   :  { %4659 = vmatpush3.bf16.msra.mxu0 %v5116_v16  ;;  %v5176_v16 = vld [vmem:[#allocation2 + $0x708] sm:$0xff]  }
  0xfd   :  { %4681 = vmatpush3.bf16.msra.mxu1 %v5117_v17  ;;  %4660 = vmatprep.subr.bf16.mxu0 %v5118_v18  ;;  %v5177_v17 = vld [vmem:[#allocation2 + $0x788] sm:$0xff]   ;;  %v5178_v18 = vld [vmem:[#allocation2 + $0x750] sm:$0xff]  }
  0xfe   :  { %4682 = vmatprep.subr.bf16.mxu1 %v5119_v19  ;;  %v5179_v19 = vld [vmem:[#allocation2 + $0x7d0] sm:$0xff]  }
 0x100   :  { %4661 = vmatpush3.bf16.msra.mxu0 %v5120_v20  ;;  %v5180_v20 = vld [vmem:[#allocation2 + $0x710] sm:$0xff]  }
 0x101   :  { %4683 = vmatpush3.bf16.msra.mxu1 %v5121_v21  ;;  %4662 = vmatprep.subr.bf16.mxu0 %v5122_v22  ;;  %v5181_v21 = vld [vmem:[#allocation2 + $0x790] sm:$0xff]   ;;  %v5182_v22 = vld [vmem:[#allocation2 + $0x758] sm:$0xff]  }
 0x102   :  { %4684 = vmatprep.subr.bf16.mxu1 %v5123_v23  ;;  %v5183_v23 = vld [vmem:[#allocation2 + $0x7d8] sm:$0xff]  }
 0x104   :  { %4663 = vmatpush3.bf16.msra.mxu0 %v5124_v24  ;;  %v5184_v24 = vld [vmem:[#allocation2 + $0x718] sm:$0xff]  }
 0x105   :  { %4685 = vmatpush3.bf16.msra.mxu1 %v5125_v25  ;;  %4664 = vmatprep.subr.bf16.mxu0 %v5126_v26  ;;  %v5185_v25 = vld [vmem:[#allocation2 + $0x798] sm:$0xff]   ;;  %v5186_v26 = vld [vmem:[#allocation2 + $0x760] sm:$0xff]  }
 0x106   :  { %4686 = vmatprep.subr.bf16.mxu1 %v5127_v27  ;;  %v5187_v27 = vld [vmem:[#allocation2 + $0x7e0] sm:$0xff]  }
 0x108   :  { %4665 = vmatpush3.bf16.msra.mxu0 %v5128_v28  ;;  %v5188_v28 = vld [vmem:[#allocation2 + $0x720] sm:$0xff]  }
 0x109   :  { %4687 = vmatpush3.bf16.msra.mxu1 %v5129_v29  ;;  %4694 = vmatprep.subr.bf16.mxu0 %v5134_v36 }
 0x10a   :  { %4716 = vmatprep.subr.bf16.mxu1 %v5135_v37  ;;  %v5190_v37 = vld [vmem:[#allocation2 + $0x768] sm:$0xff]  }
 0x10b   :  { %3235 = vmatmul.mubr.bf16.vlgmr.msra.gmra.mrb[20].mxu0 %v4048_v32  ;;  %v4027_v32 = vld [vmem:[#allocation7] ss:$0 sm:$0xff] }
 0x10c   :  { %3275 = vmatmul.mubr.bf16.vlgmr.msra.gmra.mrb[20].mxu1 %v4050_v34  ;;  %4695 = vmatpush3.bf16.msra.mxu0 %v5136_v38 }
 0x10d   :  { %4717 = vmatpush3.bf16.msra.mxu1 %v5137_v39  ;;  %4696 = vmatprep.subr.bf16.mxu0 %v5138_v40  ;;  %v5191_v39 = vld [vmem:[#allocation2 + $0x7e8] sm:$0xff]  }
 0x10e   :  { %4718 = vmatprep.subr.bf16.mxu1 %v5139_v41  ;;  %3314 = vmatprep.mubr.bf16.mxu0 %v4053_v7  ;;  %v5216_v7 = vld [vmem:[#allocation2 + $0x810] sm:$0xff]  }
 0x10f   :  { %3354 = vmatprep.mubr.bf16.mxu1 %v4055_v10  ;;  %v5219_v10 = vld [vmem:[#allocation2 + $0x8d8] sm:$0xff]  }
 0x110   :  { %4697 = vmatpush3.bf16.msra.mxu0 %v5140_v42  ;;  %v5192_v42 = vld [vmem:[#allocation2 + $0x728] sm:$0xff]  }
 0x111   :  { %4719 = vmatpush3.bf16.msra.mxu1 %v5141_v43  ;;  %4698 = vmatprep.subr.bf16.mxu0 %v5142_v44  ;;  %v5193_v44 = vld [vmem:[#allocation2 + $0x7a8] sm:$0xff]  }
 0x112   :  { %4720 = vmatprep.subr.bf16.mxu1 %v5143_v45 }
 0x114   :  { %4699 = vmatpush3.bf16.msra.mxu0 %v5144_v46 }
 0x115   :  { %4721 = vmatpush3.bf16.msra.mxu1 %v5145_v47  ;;  %4700 = vmatprep.subr.bf16.mxu0 %v5146_v48  ;;  %v5194_v47 = vld [vmem:[#allocation2 + $0x770] sm:$0xff]  }
 0x116   :  { %4722 = vmatprep.subr.bf16.mxu1 %v5147_v49  ;;  %v5195_v48 = vld [vmem:[#allocation2 + $0x7f0] sm:$0xff]  }
 0x117   :  { %v5196_v49 = vld [vmem:[#allocation2 + $0x730] sm:$0xff]  }
 0x118   :  { %4701 = vmatpush3.bf16.msra.mxu0 %v5148_v50  ;;  %v5197_v50 = vld [vmem:[#allocation2 + $0x7b0] sm:$0xff]  }
 0x119   :  { %4723 = vmatpush3.bf16.msra.mxu1 %v5149_v51  ;;  %4702 = vmatprep.subr.bf16.mxu0 %v5150_v52  ;;  %v5198_v51 = vld [vmem:[#allocation2 + $0x778] sm:$0xff]  }
 0x11a   :  { %4724 = vmatprep.subr.bf16.mxu1 %v5151_v53  ;;  %v5199_v52 = vld [vmem:[#allocation2 + $0x7f8] sm:$0xff]  }
 0x11b   :  { %v5200_v53 = vld [vmem:[#allocation2 + $0x738] sm:$0xff]  }
 0x11c   :  { %4703 = vmatpush3.bf16.msra.mxu0 %v5152_v54  ;;  %v5201_v54 = vld [vmem:[#allocation2 + $0x7b8] sm:$0xff]  }
 0x11d   :  { %4725 = vmatpush3.bf16.msra.mxu1 %v5153_v55  ;;  %4704 = vmatprep.subr.bf16.mxu0 %v5154_v56  ;;  %v91_v55 = vld [vmem:[%s5610_s0 + $0x70] sm:$0xff]  ;;  %v92_v56 = vld [vmem:[%s5610_s0 + $0x78] sm:$0xff] }
 0x11e   :  { %4726 = vmatprep.subr.bf16.mxu1 %v5155_v57  ;;  %v4056_v57 = vcombine.low %v91_v55, %v91_v55 }
 0x120   :  { %4705 = vmatpush3.bf16.msra.mxu0 %v5156_v58  ;;  %v4057_v58 = vcombine.high %v91_v55, %v91_v55  ;;  %v5250_v55 = vld [vmem:[#allocation2 + $0x950] sm:$0xff]  }
 0x121   :  { %4727 = vmatpush3.bf16.msra.mxu1 %v5157_v59  ;;  %4706 = vmatprep.subr.bf16.mxu0 %v5158_v60  ;;  %v4058_v59 = vcombine.low %v92_v56, %v92_v56  ;;  %v4059_v60 = vcombine.high %v92_v56, %v92_v56  ;;  %v5251_v56 = vld [vmem:[#allocation2 + $0x9d0] sm:$0xff]  }
 0x122   :  { %4728 = vmatprep.subr.bf16.mxu1 %v5159_v61  ;;  %v5206_v61 = vld [vmem:[#allocation2 + $0x840] sm:$0xff]  }
 0x124   :  { %4707 = vmatpush3.bf16.msra.mxu0 %v5160_v62  ;;  %v5207_v62 = vld [vmem:[#allocation2 + $0x8c0] sm:$0xff]  }
 0x125   :  { %4729 = vmatpush3.bf16.msra.mxu1 %v5161_v63  ;;  %4708 = vmatprep.subr.bf16.mxu0 %v5162_v0  ;;  %v5208_v63 = vld [vmem:[#allocation2 + $0x800] sm:$0xff]  }
 0x126   :  { %4730 = vmatprep.subr.bf16.mxu1 %v5163_v1  ;;  %v5209_v0 = vld [vmem:[#allocation2 + $0x880] sm:$0xff]   ;;  %v5210_v1 = vld [vmem:[#allocation2 + $0x848] sm:$0xff]  }
 0x128   :  { %4709 = vmatpush3.bf16.msra.mxu0 %v5164_v2  ;;  %v5211_v2 = vld [vmem:[#allocation2 + $0x8c8] sm:$0xff]  }
 0x129   :  { %4731 = vmatpush3.bf16.msra.mxu1 %v5165_v3  ;;  %4738 = vmatprep.subr.bf16.mxu0 %v5170_v9  ;;  %v5212_v3 = vld [vmem:[#allocation2 + $0x808] sm:$0xff]   ;;  %v5218_v9 = vld [vmem:[#allocation2 + $0x858] sm:$0xff]  }
 0x12a   :  { %4760 = vmatprep.subr.bf16.mxu1 %v5171_v11  ;;  %v5220_v11 = vld [vmem:[#allocation2 + $0x818] sm:$0xff]  }
 0x12b   :  { %3315 = vmatmul.mubr.bf16.vlgmr.msra.gmra.mrb[24].mxu0 %v4052_v6  ;;  %v5215_v6 = vld [vmem:[#allocation2 + $0x8d0] sm:$0xff]  }
 0x12c   :  { %3355 = vmatmul.mubr.bf16.vlgmr.msra.gmra.mrb[24].mxu1 %v4054_v8  ;;  %4739 = vmatpush3.bf16.msra.mxu0 %v5172_v12  ;;  %v5217_v8 = vld [vmem:[#allocation2 + $0x890] sm:$0xff]   ;;  %v5221_v12 = vld [vmem:[#allocation2 + $0x898] sm:$0xff]  }
 0x12d   :  { %4761 = vmatpush3.bf16.msra.mxu1 %v5173_v13  ;;  %4740 = vmatprep.subr.bf16.mxu0 %v5174_v14  ;;  %v5222_v13 = vld [vmem:[#allocation2 + $0x860] sm:$0xff]  }
 0x12e   :  { %4762 = vmatprep.subr.bf16.mxu1 %v5175_v15  ;;  %3394 = vmatprep.mubr.bf16.mxu0 %v4057_v58  ;;  %v5223_v14 = vld [vmem:[#allocation2 + $0x8e0] sm:$0xff]   ;;  %v5253_v58 = vld [vmem:[#allocation2 + $0x990] sm:$0xff]  }
 0x12f   :  { %3434 = vmatprep.mubr.bf16.mxu1 %v4059_v60  ;;  %v5224_v15 = vld [vmem:[#allocation2 + $0x820] sm:$0xff]   ;;  %v5255_v60 = vld [vmem:[#allocation2 + $0x9d8] sm:$0xff]  }
 0x130   :  { %4741 = vmatpush3.bf16.msra.mxu0 %v5176_v16 }
 0x131   :  { %4763 = vmatpush3.bf16.msra.mxu1 %v5177_v17  ;;  %4742 = vmatprep.subr.bf16.mxu0 %v5178_v18  ;;  %v5225_v17 = vld [vmem:[#allocation2 + $0x8a0] sm:$0xff]  }
 0x132   :  { %4764 = vmatprep.subr.bf16.mxu1 %v5179_v19 }
 0x134   :  { %4743 = vmatpush3.bf16.msra.mxu0 %v5180_v20 }
 0x135   :  { %4765 = vmatpush3.bf16.msra.mxu1 %v5181_v21  ;;  %4744 = vmatprep.subr.bf16.mxu0 %v5182_v22 }
 0x136   :  { %4766 = vmatprep.subr.bf16.mxu1 %v5183_v23  ;;  %v5226_v23 = vld [vmem:[#allocation2 + $0x868] sm:$0xff]  }
 0x138   :  { %4745 = vmatpush3.bf16.msra.mxu0 %v5184_v24 }
 0x139   :  { %4767 = vmatpush3.bf16.msra.mxu1 %v5185_v25  ;;  %4746 = vmatprep.subr.bf16.mxu0 %v5186_v26  ;;  %v5227_v25 = vld [vmem:[#allocation2 + $0x8e8] sm:$0xff]  }
 0x13a   :  { %4768 = vmatprep.subr.bf16.mxu1 %v5187_v27 }
 0x13c   :  { %4747 = vmatpush3.bf16.msra.mxu0 %v5188_v28  ;;  %v5228_v28 = vld [vmem:[#allocation2 + $0x828] sm:$0xff]  }
 0x13d   :  { %4769 = vmatpush3.bf16.msra.mxu1 %v5189_v30  ;;  %4748 = vmatprep.subr.bf16.mxu0 %v5190_v37  ;;  %v5229_v30 = vld [vmem:[#allocation2 + $0x8a8] sm:$0xff]   ;;  %v5234_v37 = vld [vmem:[#allocation2 + $0x878] sm:$0xff]  }
 0x13e   :  { %v4446_v29 = vpop.f32.mrb[0].mxu0  ;;  %4770 = vmatprep.subr.bf16.mxu1 %v5191_v39  ;;  %v5236_v39 = vld [vmem:[#allocation2 + $0x838] sm:$0xff]  }
 0x13f   :  { %v4468_v31 = vpop.f32.mrb[0].mxu1  ;;  %v4447_v33 = vpop.f32.mrb[1].mxu0 }
 0x140   :  { %v4469_v34 = vpop.f32.mrb[1].mxu1  ;;  %v4448_v35 = vadd.f32 %v4447_v33, %v4446_v29  ;;  %v4449_v38 = vpop.f32.mrb[2].mxu0  ;;  %4749 = vmatpush3.bf16.msra.mxu0 %v5192_v42  ;;  %v5230_v33 = vld [vmem:[#allocation2 + $0x870] sm:$0xff]   ;;  %v94_v42 = vld [vmem:[%s5610_s0 + $0x88] sm:$0xff] }
 0x141   :  { %v4470_v36 = vadd.f32 %v4469_v34, %v4468_v31  ;;  %v4471_v40 = vpop.f32.mrb[2].mxu1  ;;  %v4450_v43 = vpop.f32.mrb[3].mxu0  ;;  %4771 = vmatpush3.bf16.msra.mxu1 %v5193_v44  ;;  %4750 = vmatprep.subr.bf16.mxu0 %v5194_v47  ;;  %v5231_v34 = vld [vmem:[#allocation2 + $0x8f0] sm:$0xff]   ;;  %v5235_v38 = vld [vmem:[#allocation2 + $0x8f8] sm:$0xff]   ;;  %v5242_v47 = vld [vmem:[#allocation2 + $0x940] sm:$0xff]  }
 0x142   :  { %v2837_v41 = vadd.f32 %v4448_v35, %v4027_v32  ;;  %v4472_v45 = vpop.f32.mrb[3].mxu1  ;;  %4772 = vmatprep.subr.bf16.mxu1 %v5195_v48  ;;  %v5232_v35 = vld [vmem:[#allocation2 + $0x830] sm:$0xff]   ;;  %v5237_v40 = vld [vmem:[#allocation2 + $0x8b8] sm:$0xff]   ;;  %v5243_v48 = vld [vmem:[#allocation2 + $0x9c0] sm:$0xff]  }
 0x143   :  { %v4062_v45 = vcombine.low %v94_v42, %v94_v42 }
 0x144   :  { %v5571_v46 = vadd.f32 %v4470_v36, %v2837_v41  ;;  %4751 = vmatpush3.bf16.msra.mxu0 %v5196_v49  ;;  %v5233_v36 = vld [vmem:[#allocation2 + $0x8b0] sm:$0xff]   ;;  %v93_v41 = vld [vmem:[%s5610_s0 + $0x80] sm:$0xff] }
 0x145   :  { %4773 = vmatpush3.bf16.msra.mxu1 %v5197_v50  ;;  %4752 = vmatprep.subr.bf16.mxu0 %v5198_v51  ;;  %v4060_v43 = vcombine.low %v93_v41, %v93_v41  ;;  %v4061_v44 = vcombine.high %v93_v41, %v93_v41  ;;  %v5244_v49 = vld [vmem:[#allocation2 + $0x900] sm:$0xff]   ;;  %v5246_v51 = vld [vmem:[#allocation2 + $0x948] sm:$0xff]  }
 0x146   :  { %4774 = vmatprep.subr.bf16.mxu1 %v5199_v52  ;;  %v5245_v50 = vld [vmem:[#allocation2 + $0x980] sm:$0xff]   ;;  %v5247_v52 = vld [vmem:[#allocation2 + $0x9c8] sm:$0xff]  }
 0x148   :  { %4753 = vmatpush3.bf16.msra.mxu0 %v5200_v53  ;;  %v5248_v53 = vld [vmem:[#allocation2 + $0x908] sm:$0xff]  }
 0x149   :  { %4775 = vmatpush3.bf16.msra.mxu1 %v5201_v54  ;;  %4782 = vmatprep.subr.bf16.mxu0 %v5206_v61  ;;  %v5249_v54 = vld [vmem:[#allocation2 + $0x988] sm:$0xff]   ;;  %v5256_v61 = vld [vmem:[#allocation2 + $0x918] sm:$0xff]  }
 0x14a   :  { %4804 = vmatprep.subr.bf16.mxu1 %v5207_v62  ;;  %v5257_v62 = vld [vmem:[#allocation2 + $0x998] sm:$0xff]  }
 0x14b   :  { %3395 = vmatmul.mubr.bf16.vlgmr.msra.gmra.mrb[28].mxu0 %v4056_v57  ;;  %v5252_v57 = vld [vmem:[#allocation2 + $0x910] sm:$0xff]  }
 0x14c   :  { %3435 = vmatmul.mubr.bf16.vlgmr.msra.gmra.mrb[28].mxu1 %v4058_v59  ;;  %4783 = vmatpush3.bf16.msra.mxu0 %v5208_v63  ;;  %v5254_v59 = vld [vmem:[#allocation2 + $0x958] sm:$0xff]   ;;  %v5258_v63 = vld [vmem:[#allocation2 + $0x960] sm:$0xff]  }
 0x14d   :  { %4805 = vmatpush3.bf16.msra.mxu1 %v5209_v0  ;;  %4784 = vmatprep.subr.bf16.mxu0 %v5210_v1  ;;  %v5259_v0 = vld [vmem:[#allocation2 + $0x9e0] sm:$0xff]  }
 0x14e   :  { %4806 = vmatprep.subr.bf16.mxu1 %v5211_v2  ;;  %3474 = vmatprep.mubr.bf16.mxu0 %v4061_v44  ;;  %v5260_v2 = vld [vmem:[#allocation2 + $0x920] sm:$0xff]  }
 0x150   :  { %4785 = vmatpush3.bf16.msra.mxu0 %v5212_v3 }
 0x151   :  { %4807 = vmatpush3.bf16.msra.mxu1 %v5213_v4  ;;  %4786 = vmatprep.subr.bf16.mxu0 %v5214_v5  ;;  %v5261_v4 = vld [vmem:[#allocation2 + $0x9a0] sm:$0xff]  }
 0x152   :  { %4808 = vmatprep.subr.bf16.mxu1 %v5215_v6 }
 0x154   :  { %4787 = vmatpush3.bf16.msra.mxu0 %v5216_v7 }
 0x155   :  { %4809 = vmatpush3.bf16.msra.mxu1 %v5217_v8  ;;  %4788 = vmatprep.subr.bf16.mxu0 %v5218_v9  ;;  %v5262_v8 = vld [vmem:[#allocation2 + $0x968] sm:$0xff]  }
 0x156   :  { %4810 = vmatprep.subr.bf16.mxu1 %v5219_v10  ;;  %v5263_v10 = vld [vmem:[#allocation2 + $0x9e8] sm:$0xff]  }
 0x158   :  { %4789 = vmatpush3.bf16.msra.mxu0 %v5220_v11 }
 0x159   :  { %4811 = vmatpush3.bf16.msra.mxu1 %v5221_v12  ;;  %4790 = vmatprep.subr.bf16.mxu0 %v5222_v13 }
 0x15a   :  { %4812 = vmatprep.subr.bf16.mxu1 %v5223_v14  ;;  %v5264_v14 = vld [vmem:[#allocation2 + $0x928] sm:$0xff]  }
 0x15c   :  { %4791 = vmatpush3.bf16.msra.mxu0 %v5224_v15  ;;  %v5265_v15 = vld [vmem:[#allocation2 + $0x9a8] sm:$0xff]  }
 0x15d   :  { %4813 = vmatpush3.bf16.msra.mxu1 %v5225_v17  ;;  %4792 = vmatprep.subr.bf16.mxu0 %v5226_v23  ;;  %v5270_v23 = vld [vmem:[#allocation2 + $0x978] sm:$0xff]  }
 0x15e   :  { %v4490_v16 = vpop.f32.mrb[4].mxu0  ;;  %4814 = vmatprep.subr.bf16.mxu1 %v5227_v25  ;;  %v5272_v25 = vld [vmem:[#allocation2 + $0x938] sm:$0xff]  }
 0x15f   :  { %v4512_v18 = vpop.f32.mrb[4].mxu1  ;;  %v4491_v19 = vpop.f32.mrb[5].mxu0 }
 0x160   :  { %v4513_v20 = vpop.f32.mrb[5].mxu1  ;;  %v4492_v21 = vadd.f32 %v4491_v19, %v4490_v16  ;;  %v4493_v24 = vpop.f32.mrb[6].mxu0  ;;  %4793 = vmatpush3.bf16.msra.mxu0 %v5228_v28  ;;  %v5266_v19 = vld [vmem:[#allocation2 + $0x970] sm:$0xff]   ;;  %v96_v28 = vld [vmem:[%s5610_s0 + $0x98] sm:$0xff] }
 0x161   :  { %v4514_v22 = vadd.f32 %v4513_v20, %v4512_v18  ;;  %v4515_v26 = vpop.f32.mrb[6].mxu1  ;;  %v4494_v29 = vpop.f32.mrb[7].mxu0  ;;  %4815 = vmatpush3.bf16.msra.mxu1 %v5229_v30  ;;  %4794 = vmatprep.subr.bf16.mxu0 %v5230_v33  ;;  %v5267_v20 = vld [vmem:[#allocation2 + $0x9f0] sm:$0xff]   ;;  %v5271_v24 = vld [vmem:[#allocation2 + $0x9f8] sm:$0xff]  }
 0x162   :  { %v2917_v27 = vadd.f32 %v4492_v21, %v5571_v46  ;;  %v4516_v31 = vpop.f32.mrb[7].mxu1  ;;  %4816 = vmatprep.subr.bf16.mxu1 %v5231_v34  ;;  %v4063_v46 = vcombine.high %v94_v42, %v94_v42  ;;  %v5268_v21 = vld [vmem:[#allocation2 + $0x930] sm:$0xff]   ;;  %v5273_v26 = vld [vmem:[#allocation2 + $0x9b8] sm:$0xff]  }
 0x163   :  { %v4066_v31 = vcombine.low %v96_v28, %v96_v28 }
 0x164   :  { %v5580_v32 = vadd.f32 %v4514_v22, %v2917_v27  ;;  %4795 = vmatpush3.bf16.msra.mxu0 %v5232_v35  ;;  %3514 = vmatprep.mubr.bf16.mxu1 %v4063_v46  ;;  %v5269_v22 = vld [vmem:[#allocation2 + $0x9b0] sm:$0xff]  }
 0x165   :  { %4817 = vmatpush3.bf16.msra.mxu1 %v5233_v36  ;;  %4796 = vmatprep.subr.bf16.mxu0 %v5234_v37  ;;  %v95_v27 = vld [vmem:[%s5610_s0 + $0x90] sm:$0xff] }
 0x166   :  { %4818 = vmatprep.subr.bf16.mxu1 %v5235_v38  ;;  %v4064_v29 = vcombine.low %v95_v27, %v95_v27  ;;  %v4065_v30 = vcombine.high %v95_v27, %v95_v27 }
 0x168   :  { %4797 = vmatpush3.bf16.msra.mxu0 %v5236_v39 }
 0x169   :  { %4819 = vmatpush3.bf16.msra.mxu1 %v5237_v40  ;;  %4826 = vmatprep.subr.bf16.mxu0 %v5242_v47 }
 0x16a   :  { %4848 = vmatprep.subr.bf16.mxu1 %v5243_v48 }
 0x16b   :  { %3475 = vmatmul.mubr.bf16.vlgmr.msra.gmra.mrb[32].mxu0 %v4060_v43 }
 0x16c   :  { %3515 = vmatmul.mubr.bf16.vlgmr.msra.gmra.mrb[32].mxu1 %v4062_v45  ;;  %4827 = vmatpush3.bf16.msra.mxu0 %v5244_v49 }
 0x16d   :  { %4849 = vmatpush3.bf16.msra.mxu1 %v5245_v50  ;;  %4828 = vmatprep.subr.bf16.mxu0 %v5246_v51 }
 0x16e   :  { %4850 = vmatprep.subr.bf16.mxu1 %v5247_v52  ;;  %3554 = vmatprep.mubr.bf16.mxu0 %v4065_v30 }
 0x170   :  { %4829 = vmatpush3.bf16.msra.mxu0 %v5248_v53 }
 0x171   :  { %4851 = vmatpush3.bf16.msra.mxu1 %v5249_v54  ;;  %4830 = vmatprep.subr.bf16.mxu0 %v5250_v55 }
 0x172   :  { %4852 = vmatprep.subr.bf16.mxu1 %v5251_v56 }
 0x174   :  { %4831 = vmatpush3.bf16.msra.mxu0 %v5252_v57  ;;  %v5278_v57 = vld [vmem:[#allocation4] ss:$16 sps:$4 sm:$0xff]  }
 0x175   :  { %4853 = vmatpush3.bf16.msra.mxu1 %v5253_v58  ;;  %4832 = vmatprep.subr.bf16.mxu0 %v5254_v59  ;;  %v5280_v58 = vld [vmem:[#allocation4 + $0x4] ss:$16 sps:$4 sm:$0xff]   ;;  %v5281_v59 = vld [vmem:[#allocation4 + $0x8] ss:$16 sps:$4 sm:$0xff]  }
 0x176   :  { %4854 = vmatprep.subr.bf16.mxu1 %v5255_v60  ;;  %v5283_v60 = vld [vmem:[#allocation4 + $0xc] ss:$16 sps:$4 sm:$0xff]  }
 0x178   :  { %4833 = vmatpush3.bf16.msra.mxu0 %v5256_v61  ;;  %v5286_v61 = vld [vmem:[#allocation4 + $0x24] ss:$16 sps:$4 sm:$0xff]  }
 0x179   :  { %4855 = vmatpush3.bf16.msra.mxu1 %v5257_v62  ;;  %4834 = vmatprep.subr.bf16.mxu0 %v5258_v63  ;;  %v5289_v62 = vld [vmem:[#allocation4 + $0x2c] ss:$16 sps:$4 sm:$0xff]   ;;  %v5284_v63 = vld [vmem:[#allocation4 + $0x20] ss:$16 sps:$4 sm:$0xff]  }
 0x17a   :  { %4856 = vmatprep.subr.bf16.mxu1 %v5259_v0  ;;  %v5287_v0 = vld [vmem:[#allocation4 + $0x28] ss:$16 sps:$4 sm:$0xff]  }
 0x17c   :  { %4835 = vmatpush3.bf16.msra.mxu0 %v5260_v2  ;;  %v5295_v2 = vld [vmem:[#allocation4 + $0x4c] ss:$16 sps:$4 sm:$0xff]  }
 0x17d   :  { %4857 = vmatpush3.bf16.msra.mxu1 %v5261_v4  ;;  %4836 = vmatprep.subr.bf16.mxu0 %v5262_v8  ;;  %v5293_v4 = vld [vmem:[#allocation4 + $0x48] ss:$16 sps:$4 sm:$0xff]  }
 0x17e   :  { %v4534_v1 = vpop.f32.mrb[8].mxu0  ;;  %4858 = vmatprep.subr.bf16.mxu1 %v5263_v10  ;;  %v5299_v8 = vld [vmem:[#allocation4 + $0x68] ss:$16 sps:$4 sm:$0xff]   ;;  %v5307_v10 = vld [vmem:[#allocation4 + $0x8c] ss:$16 sps:$4 sm:$0xff]  }
 0x17f   :  { %v4556_v3 = vpop.f32.mrb[8].mxu1  ;;  %v4535_v5 = vpop.f32.mrb[9].mxu0 }
 0x180   :  { %v4536_v6 = vadd.f32 %v4535_v5, %v4534_v1  ;;  %v4557_v7 = vpop.f32.mrb[9].mxu1  ;;  %v4537_v11 = vpop.f32.mrb[10].mxu0  ;;  %4837 = vmatpush3.bf16.msra.mxu0 %v5264_v14  ;;  %v5292_v1 = vld [vmem:[#allocation4 + $0x44] ss:$16 sps:$4 sm:$0xff]   ;;  %v5313_v14 = vld [vmem:[#allocation4 + $0xac] ss:$16 sps:$4 sm:$0xff]  }
 0x181   :  { %v4558_v9 = vadd.f32 %v4557_v7, %v4556_v3  ;;  %v4559_v13 = vpop.f32.mrb[10].mxu1  ;;  %v4538_v16 = vpop.f32.mrb[11].mxu0  ;;  %4859 = vmatpush3.bf16.msra.mxu1 %v5265_v15  ;;  %4838 = vmatprep.subr.bf16.mxu0 %v5266_v19  ;;  %v5290_v3 = vld [vmem:[#allocation4 + $0x40] ss:$16 sps:$4 sm:$0xff]   ;;  %v5298_v5 = vld [vmem:[#allocation4 + $0x64] ss:$16 sps:$4 sm:$0xff]  }
 0x182   :  { %v2997_v12 = vadd.f32 %v4536_v6, %v5580_v32  ;;  %v4560_v18 = vpop.f32.mrb[11].mxu1  ;;  %4860 = vmatprep.subr.bf16.mxu1 %v5267_v20  ;;  %v4067_v32 = vcombine.high %v96_v28, %v96_v28  ;;  %v5301_v6 = vld [vmem:[#allocation4 + $0x6c] ss:$16 sps:$4 sm:$0xff]   ;;  %v5296_v7 = vld [vmem:[#allocation4 + $0x60] ss:$16 sps:$4 sm:$0xff]  }
 0x183   :  { %v5302_v11 = vld [vmem:[#allocation4 + $0x80] ss:$16 sps:$4 sm:$0xff]   ;;  %v5310_v13 = vld [vmem:[#allocation4 + $0xa4] ss:$16 sps:$4 sm:$0xff]   ;;  %v5311_v16 = vld [vmem:[#allocation4 + $0xa8] ss:$16 sps:$4 sm:$0xff]  }
 0x184   :  { %v3037_v17 = vadd.f32 %v4558_v9, %v2997_v12  ;;  %4839 = vmatpush3.bf16.msra.mxu0 %v5268_v21  ;;  %3594 = vmatprep.mubr.bf16.mxu1 %v4067_v32  ;;  %v5304_v9 = vld [vmem:[#allocation4 + $0x84] ss:$16 sps:$4 sm:$0xff]   ;;  %v5305_v12 = vld [vmem:[#allocation4 + $0x88] ss:$16 sps:$4 sm:$0xff]   ;;  %v5308_v15 = vld [vmem:[#allocation4 + $0xa0] ss:$16 sps:$4 sm:$0xff]  }
 0x185   :  { %4861 = vmatpush3.bf16.msra.mxu1 %v5269_v22  ;;  %4840 = vmatprep.subr.bf16.mxu0 %v5270_v23  ;;  %v5316_v28 = vld [vmem:[#allocation4 + $0xc4] ss:$16 sps:$4 sm:$0xff]   ;;  %v5317_v32 = vld [vmem:[#allocation4 + $0xc8] ss:$16 sps:$4 sm:$0xff]  }
 0x186   :  { %4862 = vmatprep.subr.bf16.mxu1 %v5271_v24 }
 0x188   :  { %4841 = vmatpush3.bf16.msra.mxu0 %v5272_v25 }
 0x189   :  { %4863 = vmatpush3.bf16.msra.mxu1 %v5273_v26  ;;  %3796 = vmatprep.subr.bf16.mxu0 %v5280_v58 }
 0x18a   :  { %3837 = vmatprep.subr.bf16.mxu1 %v5283_v60 }
 0x18b   :  { %3555 = vmatmul.mubr.bf16.vlgmr.msra.gmra.mrb[36].mxu0 %v4064_v29  ;;  %v5319_v29 = vld [vmem:[#allocation4 + $0xcc] ss:$16 sps:$4 sm:$0xff]  }
 0x18c   :  { %3595 = vmatmul.mubr.bf16.vlgmr.msra.gmra.mrb[36].mxu1 %v4066_v31  ;;  %3797 = vmatpush1.bf16.msra.mxu0 %v5278_v57  ;;  %v5314_v31 = vld [vmem:[#allocation4 + $0xc0] ss:$16 sps:$4 sm:$0xff]  }
 0x18d   :  { %3838 = vmatpush1.bf16.msra.mxu1 %v5281_v59  ;;  %3798 = vmatprep.subr.bf16.mxu0 %v5286_v61 }
 0x18e   :  { %3839 = vmatprep.subr.bf16.mxu1 %v5289_v62 }
 0x190   :  { %3799 = vmatpush1.bf16.msra.mxu0 %v5284_v63 }
 0x191   :  { %3840 = vmatpush1.bf16.msra.mxu1 %v5287_v0  ;;  %3800 = vmatprep.subr.bf16.mxu0 %v5292_v1 }
 0x192   :  { %3841 = vmatprep.subr.bf16.mxu1 %v5295_v2 }
 0x194   :  { %3801 = vmatpush1.bf16.msra.mxu0 %v5290_v3 }
 0x195   :  { %3842 = vmatpush1.bf16.msra.mxu1 %v5293_v4  ;;  %3802 = vmatprep.subr.bf16.mxu0 %v5298_v5 }
 0x196   :  { %3843 = vmatprep.subr.bf16.mxu1 %v5301_v6 }
 0x198   :  { %3803 = vmatpush1.bf16.msra.mxu0 %v5296_v7 }
 0x199   :  { %3844 = vmatpush1.bf16.msra.mxu1 %v5299_v8  ;;  %3804 = vmatprep.subr.bf16.mxu0 %v5304_v9 }
 0x19a   :  { %3845 = vmatprep.subr.bf16.mxu1 %v5307_v10 }
 0x19c   :  { %3805 = vmatpush1.bf16.msra.mxu0 %v5302_v11 }
 0x19d   :  { %3846 = vmatpush1.bf16.msra.mxu1 %v5305_v12  ;;  %3806 = vmatprep.subr.bf16.mxu0 %v5310_v13 }
 0x19e   :  { %v4578_v33 = vpop.f32.mrb[12].mxu0  ;;  %3847 = vmatprep.subr.bf16.mxu1 %v5313_v14 }
 0x19f   :  { %v4600_v34 = vpop.f32.mrb[12].mxu1  ;;  %v4579_v35 = vpop.f32.mrb[13].mxu0 }
 0x1a0   :  { %v4580_v36 = vadd.f32 %v4579_v35, %v4578_v33  ;;  %v4601_v37 = vpop.f32.mrb[13].mxu1  ;;  %v4581_v38 = vpop.f32.mrb[14].mxu0  ;;  %3807 = vmatpush1.bf16.msra.mxu0 %v5308_v15  ;;  %v5322_v33 = vld [vmem:[#allocation4 + $0xe4] ss:$16 sps:$4 sm:$0xff]   ;;  %v5320_v35 = vld [vmem:[#allocation4 + $0xe0] ss:$16 sps:$4 sm:$0xff]  }
 0x1a1   :  { %v4602_v39 = vadd.f32 %v4601_v37, %v4600_v34  ;;  %v4603_v40 = vpop.f32.mrb[14].mxu1  ;;  %v4582_v41 = vpop.f32.mrb[15].mxu0  ;;  %3848 = vmatpush1.bf16.msra.mxu1 %v5311_v16  ;;  %3808 = vmatprep.subr.bf16.mxu0 %v5316_v28  ;;  %v5325_v34 = vld [vmem:[#allocation4 + $0xec] ss:$16 sps:$4 sm:$0xff]   ;;  %v5440_v37 = vmov 0   ;;  %v3602_v38 = vld [vmem:[%s5615_s5] sm:$0xff] }
 0x1a2   :  { %v3077_v42 = vadd.f32 %v4580_v36, %v3037_v17  ;;  %v4604_v43 = vpop.f32.mrb[15].mxu1  ;;  %3849 = vmatprep.subr.bf16.mxu1 %v5319_v29  ;;  %v5323_v36 = vld [vmem:[#allocation4 + $0xe8] ss:$16 sps:$4 sm:$0xff]   ;;  %3828 = vmatprep.mubr.bf16.mxu0 %v5440_v37  ;;  %v5442_v40 = vmov 0.0   ;;  %v5443_v41 = vmov 1  }
 0x1a3   :  { %3869 = vmatprep.mubr.bf16.mxu1 %v5440_v37  ;;  %4913 = vset.pattern.permute.xlu0 %v5440_v37  ;;  %v5327_v29 = vld [vmem:[#allocation6 + $0x8] sm:$0xff]  }
 0x1a4   :  { %v3117_v44 = vadd.f32 %v4602_v39, %v3077_v42  ;;  %3809 = vmatpush1.bf16.msra.mxu0 %v5314_v31  ;;  %v5441_v39 = vmov 2   ;;  %3880 = vperm.xlu0 %4913, %v3602_v38   ;;  %v5444_v42 = vmov 3   ;;  %v5329_v31 = vld [vmem:[#allocation6 + $0x18] sm:$0xff]  }
 0x1a5   :  { %3850 = vmatpush1.bf16.msra.mxu1 %v5317_v32  ;;  %3810 = vmatprep.subr.bf16.mxu0 %v5322_v33  ;;  %v5330_v32 = vld [vmem:[#allocation6 + $0x20] sm:$0xff]   ;;  %v5331_v33 = vld [vmem:[#allocation6 + $0x28] sm:$0xff]  }
 0x1a6   :  { %3851 = vmatprep.subr.bf16.mxu1 %v5325_v34  ;;  %4915 = vset.pattern.permute.xlu1 %v5441_v39  ;;  %v5332_v34 = vld [vmem:[#allocation6 + $0x30] sm:$0xff]  }
 0x1a7   :  { %3892 = vperm.xlu1 %4915, %v3602_v38  }
 0x1a8   :  { %3811 = vmatpush1.bf16.msra.mxu0 %v5320_v35  ;;  %4914 = vset.pattern.permute.xlu0 %v5443_v41  ;;  %v5333_v35 = vld [vmem:[#allocation6 + $0x38] sm:$0xff]  }
 0x1a9   :  { %3852 = vmatpush1.bf16.msra.mxu1 %v5323_v36  ;;  %4879 = vmatprep.subr.bf16.mxu0 %v5442_v40 }
 0x1aa   :  { %3886 = vperm.xlu0 %4914, %v3602_v38  }
 0x1ab   :  { %4916 = vset.pattern.permute.xlu1 %v5444_v42 }
 0x1ac   :  { %3898 = vperm.xlu1 %4916, %v3602_v38  }
 0x1ae   :  { %4917 = vset.pattern.permute.xlu0 %v5444_v42 }
 0x1be   :  { %v4622_v45 = vpop.f32.mrb[16].mxu0 }
 0x1bf   :  { %v4644_v46 = vpop.f32.mrb[16].mxu1  ;;  %v4623_v47 = vpop.f32.mrb[17].mxu0 }
 0x1c0   :  { %v4645_v48 = vpop.f32.mrb[17].mxu1  ;;  %v4624_v49 = vadd.f32 %v4623_v47, %v4622_v45  ;;  %v4625_v51 = vpop.f32.mrb[18].mxu0 }
 0x1c1   :  { %v4646_v50 = vadd.f32 %v4645_v48, %v4644_v46  ;;  %v4647_v52 = vpop.f32.mrb[18].mxu1  ;;  %v4626_v53 = vpop.f32.mrb[19].mxu0 }
 0x1c2   :  { %v4648_v54 = vpop.f32.mrb[19].mxu1  ;;  %v3157_v55 = vadd.f32 %v4624_v49, %v3117_v44 }
 0x1c4   :  { %v3197_v56 = vadd.f32 %v4646_v50, %v3157_v55 }
 0x1de   :  { %v4666_v17 = vpop.f32.mrb[20].mxu0 }
 0x1df   :  { %v4688_v18 = vpop.f32.mrb[20].mxu1  ;;  %v4667_v19 = vpop.f32.mrb[21].mxu0 }
 0x1e0   :  { %v4668_v20 = vadd.f32 %v4667_v19, %v4666_v17  ;;  %v4689_v21 = vpop.f32.mrb[21].mxu1  ;;  %v4669_v22 = vpop.f32.mrb[22].mxu0 }
 0x1e1   :  { %v4690_v23 = vadd.f32 %v4689_v21, %v4688_v18  ;;  %v4691_v24 = vpop.f32.mrb[22].mxu1  ;;  %v4670_v25 = vpop.f32.mrb[23].mxu0 }
 0x1e2   :  { %v3237_v26 = vadd.f32 %v4668_v20, %v3197_v56  ;;  %v4692_v27 = vpop.f32.mrb[23].mxu1 }
 0x1e3   :  { %v5326_v27 = vld [vmem:[#allocation6] sm:$0xff]  }
 0x1e4   :  { %v3277_v30 = vadd.f32 %v4690_v23, %v3237_v26 }
 0x1fe   :  { %v4710_v43 = vpop.f32.mrb[24].mxu0 }
 0x1ff   :  { %v4732_v44 = vpop.f32.mrb[24].mxu1  ;;  %v4711_v45 = vpop.f32.mrb[25].mxu0 }
 0x200   :  { %v4712_v46 = vadd.f32 %v4711_v45, %v4710_v43  ;;  %v4733_v47 = vpop.f32.mrb[25].mxu1  ;;  %v4713_v48 = vpop.f32.mrb[26].mxu0 }
 0x201   :  { %v4734_v49 = vadd.f32 %v4733_v47, %v4732_v44  ;;  %v4735_v50 = vpop.f32.mrb[26].mxu1  ;;  %v4714_v51 = vpop.f32.mrb[27].mxu0 }
 0x202   :  { %v3317_v52 = vadd.f32 %v4712_v46, %v3277_v30  ;;  %v4736_v53 = vpop.f32.mrb[27].mxu1  ;;  %v5328_v30 = vld [vmem:[#allocation6 + $0x10] sm:$0xff]  }
 0x204   :  { %v3357_v54 = vadd.f32 %v4734_v49, %v3317_v52 }
 0x21e   :  { %v4754_v55 = vpop.f32.mrb[28].mxu0 }
 0x21f   :  { %v4776_v56 = vpop.f32.mrb[28].mxu1  ;;  %v4755_v57 = vpop.f32.mrb[29].mxu0 }
 0x220   :  { %v4756_v58 = vadd.f32 %v4755_v57, %v4754_v55  ;;  %v4777_v59 = vpop.f32.mrb[29].mxu1  ;;  %v4757_v60 = vpop.f32.mrb[30].mxu0 }
 0x221   :  { %v4778_v61 = vadd.f32 %v4777_v59, %v4776_v56  ;;  %v4779_v62 = vpop.f32.mrb[30].mxu1  ;;  %v4758_v63 = vpop.f32.mrb[31].mxu0  ;;  %v4420_v56 = vld [vmem:[#allocation7 + $0x1] ss:$0 sm:$0xff] }
 0x222   :  { %v3397_v0 = vadd.f32 %v4756_v58, %v3357_v54  ;;  %v4780_v1 = vpop.f32.mrb[31].mxu1 }
 0x223   :  { %v3881_v36 = vpop.permute.xlu0 %3880 }
 0x224   :  { %v3437_v2 = vadd.f32 %v4778_v61, %v3397_v0 }
 0x226   :  { %v3893_v37 = vpop.permute.xlu1 %3892 }
 0x229   :  { %v3887_v39 = vpop.permute.xlu0 %3886 }
 0x22b   :  { %v3899_v38 = vpop.permute.xlu1 %3898 }
 0x23e   :  { %v4798_v3 = vpop.f32.mrb[32].mxu0 }
 0x23f   :  { %v4820_v4 = vpop.f32.mrb[32].mxu1  ;;  %v4799_v5 = vpop.f32.mrb[33].mxu0 }
 0x240   :  { %v4800_v6 = vadd.f32 %v4799_v5, %v4798_v3  ;;  %v4821_v7 = vpop.f32.mrb[33].mxu1  ;;  %v4801_v8 = vpop.f32.mrb[34].mxu0 }
 0x241   :  { %v4822_v9 = vadd.f32 %v4821_v7, %v4820_v4  ;;  %v4823_v10 = vpop.f32.mrb[34].mxu1  ;;  %v4802_v11 = vpop.f32.mrb[35].mxu0 }
 0x242   :  { %v3477_v12 = vadd.f32 %v4800_v6, %v3437_v2  ;;  %v4824_v13 = vpop.f32.mrb[35].mxu1 }
 0x244   :  { %v3517_v14 = vadd.f32 %v4822_v9, %v3477_v12 }
 0x25e   :  { %v4842_v15 = vpop.f32.mrb[36].mxu0 }
 0x25f   :  { %v4864_v16 = vpop.f32.mrb[36].mxu1  ;;  %v4843_v17 = vpop.f32.mrb[37].mxu0 }
 0x260   :  { %v4844_v18 = vadd.f32 %v4843_v17, %v4842_v15  ;;  %v4865_v19 = vpop.f32.mrb[37].mxu1  ;;  %v4845_v20 = vpop.f32.mrb[38].mxu0 }
 0x261   :  { %v4866_v21 = vadd.f32 %v4865_v19, %v4864_v16  ;;  %v4867_v22 = vpop.f32.mrb[38].mxu1  ;;  %v4846_v23 = vpop.f32.mrb[39].mxu0 }
 0x262   :  { %v3557_v24 = vadd.f32 %v4844_v18, %v3517_v14  ;;  %v4868_v25 = vpop.f32.mrb[39].mxu1 }
 0x264   :  { %v3597_v26 = vadd.f32 %v4866_v21, %v3557_v24 }
 0x266   :  { %v3603_v28 = vpack.c.bf16 %v3597_v26, %v3597_v26 }
 0x268   :  { %3829 = vmatmul.mubr.bf16.vlgmr.msra.gmra.mrb[40].mxu0 %v3603_v28  ;;  %3870 = vmatmul.mubr.bf16.vlgmr.msra.gmra.mrb[40].mxu1 %v3603_v28 }
 0x269   :  { %4880 = vmatpush3.bf16.msra.mxu0 %v5326_v27  ;;  %4895 = vmatprep.mubr.msk.bf16.mxu0 %vm5445_vm0, %v5442_v40 }
 0x26a   :  { %4881 = vmatprep.subr.bf16.mxu0 %v5442_v40 }
 0x26d   :  { %4882 = vmatpush3.bf16.msra.mxu0 %v5327_v29 }
 0x26e   :  { %4883 = vmatprep.subr.bf16.mxu0 %v5442_v40 }
 0x271   :  { %4884 = vmatpush3.bf16.msra.mxu0 %v5328_v30 }
 0x272   :  { %4885 = vmatprep.subr.bf16.mxu0 %v5442_v40 }
 0x275   :  { %4886 = vmatpush3.bf16.msra.mxu0 %v5329_v31 }
 0x276   :  { %4887 = vmatprep.subr.bf16.mxu0 %v5442_v40 }
 0x279   :  { %4888 = vmatpush3.bf16.msra.mxu0 %v5330_v32 }
 0x27a   :  { %4889 = vmatprep.subr.bf16.mxu0 %v5442_v40 }
 0x27d   :  { %4890 = vmatpush3.bf16.msra.mxu0 %v5331_v33 }
 0x27e   :  { %4891 = vmatprep.subr.bf16.mxu0 %v5442_v40 }
 0x281   :  { %4892 = vmatpush3.bf16.msra.mxu0 %v5332_v34 }
 0x282   :  { %4893 = vmatprep.subr.bf16.mxu0 %v5442_v40 }
 0x285   :  { %4894 = vmatpush3.bf16.msra.mxu0 %v5333_v35 }
 0x33b   :  { %v3830_v41 = vpop.f32.mrb[40].mxu0  ;;  %v3871_v42 = vpop.f32.mrb[40].mxu1 }
 0x33c   :  { %v3883_v43 = vmul.f32 %v3881_v36, %v3830_v41  ;;  %v3832_v44 = vpop.f32.mrb[41].mxu0  ;;  %v3873_v45 = vpop.f32.mrb[41].mxu1  ;;  %v3895_v51 = vmul.f32 %v3893_v37, %v3871_v42 }
 0x33d   :  { %v3889_v46 = vmul.f32 %v3887_v39, %v3832_v44  ;;  %v3834_v47 = vpop.f32.mrb[42].mxu0  ;;  %v3875_v48 = vpop.f32.mrb[42].mxu1  ;;  %v3901_v54 = vmul.f32 %v3899_v38, %v3873_v45 }
 0x33e   :  { %v3835_v49 = vpop.f32.mrb[43].mxu0  ;;  %v3876_v50 = vpop.f32.mrb[43].mxu1 }
 0x33f   :  { %v3890_v52 = vadd.f32 %v3889_v46, %v3883_v43 }
 0x341   :  { %v3896_v53 = vadd.f32 %v3895_v51, %v3890_v52 }
 0x343   :  { %v3902_v55 = vadd.f32 %v3901_v54, %v3896_v53 }
 0x345   :  { %v3903_v40 = vpack.c.bf16 %v3902_v55, %v3902_v55 }
 0x347   :  { %4896 = vmatmul.mubr.bf16.vlgmr.msra.gmra.mrb[44].mxu0 %v3903_v40 }
 0x41a   :  { %v4007_v57 = vpop.f32.mrb[44].mxu0 }
 0x41b   :  { %v4008_v58 = vadd.f32 %v4420_v56, %v4007_v57  ;;  %v4897_v59 = vpop.f32.mrb[45].mxu0 }
 0x41c   :  { %v4010_v60 = vpop.f32.mrb[46].mxu0 }
 0x41d   :  { %v4429_v61 = vmul.f32 -1.442695, %v4008_v58  ;;  %v4898_v62 = vpop.f32.mrb[47].mxu0 }
 0x41f   :  { %5334 = vpow2.f32 %v4429_v61 }
 0x429   :  { %v5335_v63 = vpop.eup %5334 }
 0x42a   :  { %v4016_v0 = vadd.f32 1.0, %v5335_v63 }
 0x42c   :  { %5336 = vrcp.f32 %v4016_v0 }
 0x436   :  { %v5337_v1 = vpop.eup %5336 }
 0x437   :  { %4019 = vst [vmem:[%s5616_s6] sm:$0xff] %v5337_v1 }
 0x438   :  { %4024 = vsyncpa [#allocation3], 1 }
 0x439   :  { %4025 = vsyncpa [#allocation5], 1 }
 0x43a   :  { %4026 = vsyncpa [#allocation8], 1 }

</bundles_post_ra>
